<compile_context>
chip_gen: v7x
topology: tpu7x:2x2x1
jax: 0.10.0
libtpu: 0.0.40
codegen_flags: <defaults>
</compile_context>

<pallas_src>
import functools
import math

import jax
import jax.numpy as jnp
import numpy as np
from jax.experimental import pallas as pl
from jax.experimental.pallas import tpu as pltpu


# ----------------------------------------------------------------------------
# Shared LSTM cell update (PyTorch gate order i, f, g, o). f32 elementwise.
# ----------------------------------------------------------------------------
def _lstm_cell(gates, c, H):
    i_g = jax.nn.sigmoid(gates[:, 0 * H:1 * H])
    f_g = jax.nn.sigmoid(gates[:, 1 * H:2 * H])
    g_g = jnp.tanh(gates[:, 2 * H:3 * H])
    o_g = jax.nn.sigmoid(gates[:, 3 * H:4 * H])
    c_new = f_g * c + i_g * g_g
    h_new = o_g * jnp.tanh(c_new)
    return h_new, c_new


# ----------------------------------------------------------------------------
# Hoisted bulk input projection for BOTH directions.
# One (T*B, D_in) @ (D_in, 8H) bf16 MXU matmul per input stream (P=1 for the
# raw input layer, P=2 for the [fwd, bwd] streams of a previous BLSTM layer),
# bias folded in once, halves stashed per-direction in f32 VMEM scratch so the
# recurrences only do the (B,H)@(H,4H) hidden matmul + cell math.
# ----------------------------------------------------------------------------
def _input_projection(x_refs, wih_ref, b_ref, gxf_sc, gxb_sc, *, T, B, D_in, G):
    gx = None
    for p, x_ref in enumerate(x_refs):                       # static, P <= 2
        xp = x_ref[...].reshape(T * B, D_in)                 # bf16
        contrib = jnp.dot(xp, wih_ref[p], preferred_element_type=jnp.float32)
        gx = contrib if gx is None else gx + contrib
    gx = (gx + b_ref[...]).reshape(T, B, 2 * G)
    # TODO(synk): keep this stash in bf16 + chunk over T at production sizes.
    gxf_sc[...] = gx[:, :, :G]
    gxb_sc[...] = gx[:, :, G:]


# ----------------------------------------------------------------------------
# Kernel: one fused bidirectional LSTM layer (intermediate layers).
# refs = (len, x_0..x_{P-1}, wih, h0, c0, whh, b, yf, yb, gxf_sc, gxb_sc)
# ----------------------------------------------------------------------------
def _bilstm_layer_kernel(*refs, T, H, B, P, D_in, unroll):
    len_ref = refs[0]
    x_refs = refs[1:1 + P]
    (wih_ref, h0_ref, c0_ref, whh_ref, b_ref,
     yf_ref, yb_ref, gxf_sc, gxb_sc) = refs[1 + P:]
    G = 4 * H

    lens = len_ref[...]                                      # (B, 1) int32
    zeros_h = jnp.zeros((B, H), jnp.float32)                 # hoisted (no CSE)
    whh_f = whh_ref[0]                                       # (H, 4H) bf16
    whh_b = whh_ref[1]

    _input_projection(x_refs, wih_ref, b_ref, gxf_sc, gxb_sc,
                      T=T, B=B, D_in=D_in, G=G)

    # Pass 1: forward recurrence on the stashed input gates.
    def fwd_body(t, carry):
        h, c = carry
        gates = gxf_sc[t] + jnp.dot(h.astype(jnp.bfloat16), whh_f,
                                    preferred_element_type=jnp.float32)
        h_new, c_new = _lstm_cell(gates, c, H)
        mask = t < lens                                      # packed-seq emu
        yf_ref[t] = jnp.where(mask, h_new, zeros_h).astype(yf_ref.dtype)
        return jnp.where(mask, h_new, h), jnp.where(mask, c_new, c)

    jax.lax.fori_loop(0, T, fwd_body, (h0_ref[0], c0_ref[0]), unroll=unroll)

    # Pass 2: backward recurrence on the stashed input gates.
    def bwd_body(s, carry):
        h, c = carry
        t = T - 1 - s
        gates = gxb_sc[t] + jnp.dot(h.astype(jnp.bfloat16), whh_b,
                                    preferred_element_type=jnp.float32)
        h_new, c_new = _lstm_cell(gates, c, H)
        mask = t < lens
        yb_ref[t] = jnp.where(mask, h_new, zeros_h).astype(yb_ref.dtype)
        return jnp.where(mask, h_new, h), jnp.where(mask, c_new, c)

    jax.lax.fori_loop(0, T, bwd_body, (h0_ref[1], c0_ref[1]), unroll=unroll)


# ----------------------------------------------------------------------------
# Kernel: last BLSTM layer fused with the task head (Linear + softmax).
# The full (T, B, 2H) sequence output is never materialized.
# refs = (len, x_0..x_{P-1}, wih, h0, c0, whh, b, wt, bt, probs, gxf, gxb)
# ----------------------------------------------------------------------------
def _bilstm_head_kernel(*refs, T, H, B, P, D_in, unroll):
    len_ref = refs[0]
    x_refs = refs[1:1 + P]
    (wih_ref, h0_ref, c0_ref, whh_ref, b_ref, wt_ref, bt_ref,
     probs_ref, gxf_sc, gxb_sc) = refs[1 + P:]
    G = 4 * H

    lens = len_ref[...]                                      # (B, 1) int32
    whh_f = whh_ref[0]
    whh_b = whh_ref[1]

    _input_projection(x_refs, wih_ref, b_ref, gxf_sc, gxb_sc,
                      T=T, B=B, D_in=D_in, G=G)

    def fwd_body(t, carry):
        h, c = carry
        gates = gxf_sc[t] + jnp.dot(h.astype(jnp.bfloat16), whh_f,
                                    preferred_element_type=jnp.float32)
        h_new, c_new = _lstm_cell(gates, c, H)
        mask = t < lens
        return jnp.where(mask, h_new, h), jnp.where(mask, c_new, c)

    # Masked updates stop at t >= len, so the final carry IS output[len-1] fwd.
    last_f, _ = jax.lax.fori_loop(0, T, fwd_body, (h0_ref[0], c0_ref[0]),
                                  unroll=unroll)

    def bwd_body(s, carry):
        h, c, last_b = carry
        t = T - 1 - s
        gates = gxb_sc[t] + jnp.dot(h.astype(jnp.bfloat16), whh_b,
                                    preferred_element_type=jnp.float32)
        h_new, c_new = _lstm_cell(gates, c, H)
        mask = t < lens
        # backward output at t = len-1 (first masked-in step of the reverse
        # sweep); rows with len == 0 (batch padding) never fire and keep zeros.
        last_b = jnp.where(t == lens - 1, h_new, last_b)
        return jnp.where(mask, h_new, h), jnp.where(mask, c_new, c), last_b

    _, _, last_b = jax.lax.fori_loop(
        0, T, bwd_body,
        (h0_ref[1], c0_ref[1], jnp.zeros((B, H), jnp.float32)), unroll=unroll)

    # Fused task head on [last_f | last_b]: Linear + softmax. No concat — the
    # head weight is pre-split per direction in the wrapper.
    logits = (jnp.dot(last_f.astype(jnp.bfloat16), wt_ref[0],
                      preferred_element_type=jnp.float32)
              + jnp.dot(last_b.astype(jnp.bfloat16), wt_ref[1],
                        preferred_element_type=jnp.float32)
              + bt_ref[...])
    m = jnp.max(logits, axis=-1, keepdims=True)
    e = jnp.exp(logits - m)
    denom = jnp.sum(e, axis=-1, keepdims=True)
    probs_ref[...] = e * pl.reciprocal(denom, approx=True)


# ----------------------------------------------------------------------------
# Wrappers
# ----------------------------------------------------------------------------
def _vmem_specs(n):
    return [pl.BlockSpec(memory_space=pltpu.MemorySpace.VMEM) for _ in range(n)]


def _nbytes(shape, dtype):
    return math.prod(shape) * np.dtype(dtype).itemsize


def _compiler_params(resident_bytes):
    # Explicit scoped-VMEM limit sized from the actual footprint (defaults are
    # only 16 MiB on v5e / 32 MiB on v6e+); clamp to v7x's 64 MiB physical.
    limit = int(min(max(2 * resident_bytes + (2 << 20), 16 << 20), 64 << 20))
    return pltpu.CompilerParams(vmem_limit_bytes=limit)


def _pick_unroll(T):
    # Partial unroll keeps LLO scheduling visibility without the program-size /
    # vreg-pressure blowup of a full unroll at production T.
    for u in (8, 4, 2):
        if T % u == 0:
            return u
    return 1


def bilstm_layer(xs, lengths2d, h0_pair, c0_pair, wih_p, whh, b):
    """One fused bidirectional LSTM layer.

    xs: list of P bf16 inputs, each (T, B, D_in) (P=1 raw input, P=2 for the
    [fwd, bwd] streams of a previous layer). Returns (yf, yb), each (T, B, H)
    bf16 — the concatenated (T, B, 2H) activation is never materialized.
    """
    P = len(xs)
    T, B, D_in = xs[0].shape
    H = h0_pair.shape[-1]
    G = 4 * H
    operands = (lengths2d, *xs, wih_p, h0_pair, c0_pair, whh, b)
    resident = (sum(int(a.size) * a.dtype.itemsize for a in operands)
                + 2 * _nbytes((T, B, H), jnp.bfloat16)       # yf, yb outputs
                + 2 * _nbytes((T, B, G), jnp.float32))       # gate stash
    kernel = functools.partial(_bilstm_layer_kernel, T=T, H=H, B=B, P=P,
                               D_in=D_in, unroll=_pick_unroll(T))
    return pl.pallas_call(
        kernel,
        out_shape=(jax.ShapeDtypeStruct((T, B, H), jnp.bfloat16),
                   jax.ShapeDtypeStruct((T, B, H), jnp.bfloat16)),
        in_specs=_vmem_specs(len(operands)),
        out_specs=(pl.BlockSpec(memory_space=pltpu.MemorySpace.VMEM),
                   pl.BlockSpec(memory_space=pltpu.MemorySpace.VMEM)),
        scratch_shapes=[pltpu.VMEM((T, B, G), jnp.float32),   # fwd in-gates
                        pltpu.VMEM((T, B, G), jnp.float32)],  # bwd in-gates
        compiler_params=_compiler_params(resident),
    )(*operands)


def bilstm_last_layer_with_head(xs, lengths2d, h0_pair, c0_pair, wih_p, whh, b,
                                wt, bt):
    """Last BLSTM layer fused with the task head. Returns softmax probs (B, C)."""
    P = len(xs)
    T, B, D_in = xs[0].shape
    H = h0_pair.shape[-1]
    C = wt.shape[-1]
    G = 4 * H
    operands = (lengths2d, *xs, wih_p, h0_pair, c0_pair, whh, b, wt, bt)
    resident = (sum(int(a.size) * a.dtype.itemsize for a in operands)
                + _nbytes((B, C), jnp.float32)
                + 2 * _nbytes((T, B, G), jnp.float32))
    kernel = functools.partial(_bilstm_head_kernel, T=T, H=H, B=B, P=P,
                               D_in=D_in, unroll=_pick_unroll(T))
    return pl.pallas_call(
        kernel,
        out_shape=jax.ShapeDtypeStruct((B, C), jnp.float32),
        in_specs=_vmem_specs(len(operands)),
        out_specs=pl.BlockSpec(memory_space=pltpu.MemorySpace.VMEM),
        scratch_shapes=[pltpu.VMEM((T, B, G), jnp.float32),
                        pltpu.VMEM((T, B, G), jnp.float32)],
        compiler_params=_compiler_params(resident),
    )(*operands)


# ----------------------------------------------------------------------------
# Model: parameters + forward
# ----------------------------------------------------------------------------
def init_params(key, *, n_input, n_hidden, n_layers, n_classes, nT):
    """Master parameters (f32) in kernel-ready layout.

    lstm[layer] = (w_ih (D, 8H) [fwd | bwd], w_hh (2, H, 4H), bias (1, 8H))
                  gate order i, f, g, o; per-direction bias is b_ih + b_hh.
    heads[t]    = (w_t (2H, C) pre-transposed, b_t (1, C)).
    Weights are cast to bf16 at call time (MXU operands); masters stay f32.
    """
    params = {"lstm": [], "heads": []}
    k = 1.0 / jnp.sqrt(jnp.float32(n_hidden))
    for layer in range(n_layers):
        d_in = n_input if layer == 0 else 2 * n_hidden
        w_ih_dirs, w_hh_dirs, b_dirs = [], [], []
        for _direction in range(2):
            key, k1, k2, k3, k4 = jax.random.split(key, 5)
            w_ih = jax.random.uniform(k1, (d_in, 4 * n_hidden),
                                      minval=-k, maxval=k, dtype=jnp.float32)
            w_hh = jax.random.uniform(k2, (n_hidden, 4 * n_hidden),
                                      minval=-k, maxval=k, dtype=jnp.float32)
            b_ih = jax.random.uniform(k3, (4 * n_hidden,),
                                      minval=-k, maxval=k, dtype=jnp.float32)
            b_hh = jax.random.uniform(k4, (4 * n_hidden,),
                                      minval=-k, maxval=k, dtype=jnp.float32)
            w_ih_dirs.append(w_ih)
            w_hh_dirs.append(w_hh)
            b_dirs.append(b_ih + b_hh)
        params["lstm"].append((
            jnp.concatenate(w_ih_dirs, axis=1),            # (D, 8H)
            jnp.stack(w_hh_dirs, axis=0),                  # (2, H, 4H)
            jnp.concatenate(b_dirs).reshape(1, -1),        # (1, 8H)
        ))
    for _t in range(nT):
        key, kw = jax.random.split(key)
        w = jax.random.uniform(kw, (n_classes, 2 * n_hidden),
                               minval=-0.5, maxval=0.5, dtype=jnp.float32)
        b = jnp.full((n_classes,), 0.5, dtype=jnp.float32)
        params["heads"].append((w.T, b.reshape(1, -1)))    # pre-transposed
    return params


def mtl_net_forward(params, input_seq, input_len, num_task, h0, c0, n_layers):
    """input_seq: (T, B, D) f32 time-major; input_len: (B,) i32 (desc sorted)."""
    T, B, _ = input_seq.shape
    H = h0.shape[-1]

    # Pad batch to a sublane multiple (8); padded rows get length 0 and are
    # inert under the recurrence masking; they are sliced off at the end.
    Bp = -(-B // 8) * 8
    pad = Bp - B
    if pad:
        input_seq = jnp.pad(input_seq, ((0, 0), (0, pad), (0, 0)))
        input_len = jnp.pad(input_len, (0, pad))
        h0 = jnp.pad(h0, ((0, 0), (0, pad), (0, 0)))
        c0 = jnp.pad(c0, ((0, 0), (0, pad), (0, 0)))
    lengths2d = input_len.reshape(Bp, 1).astype(jnp.int32)

    xs = [input_seq.astype(jnp.bfloat16)]     # per-direction input streams
    for layer in range(n_layers):
        w_ih, w_hh, b = params["lstm"][layer]
        P = len(xs)
        D_in = xs[0].shape[-1]
        wih_p = w_ih.reshape(P, D_in, 8 * H).astype(jnp.bfloat16)
        whh = w_hh.astype(jnp.bfloat16)
        h0_pair = h0[2 * layer:2 * layer + 2]
        c0_pair = c0[2 * layer:2 * layer + 2]
        if layer < n_layers - 1:
            yf, yb = bilstm_layer(xs, lengths2d, h0_pair, c0_pair,
                                  wih_p, whh, b)
            xs = [yf, yb]
            # eval mode: inter-layer dropout is identity
        else:
            w_t, b_t = params["heads"][num_task]
            wt = w_t.reshape(2, H, -1).astype(jnp.bfloat16)  # split fwd/bwd rows
            probs = bilstm_last_layer_with_head(xs, lengths2d, h0_pair, c0_pair,
                                                wih_p, whh, b, wt, b_t)
            return probs[:B]


# ----------------------------------------------------------------------------
# Pure-JAX reference (mirrors the PyTorch module) for correctness checking.
# matmul_dtype=bf16 reproduces the kernels' MXU numerics (f32 accumulation).
# ----------------------------------------------------------------------------
def mtl_net_reference(params, input_seq, input_len, num_task, h0, c0, n_layers,
                      matmul_dtype=jnp.float32):
    T, B, _ = input_seq.shape
    H = h0.shape[-1]
    G = 4 * H
    lens = input_len.astype(jnp.int32)
    x = input_seq.astype(jnp.float32)

    def mm(a, w):
        return jnp.dot(a.astype(matmul_dtype), w.astype(matmul_dtype),
                       preferred_element_type=jnp.float32)

    def cell(x_t, h, c, w_i, w_h, bias):
        gates = mm(x_t, w_i) + mm(h, w_h) + bias
        return _lstm_cell(gates, c, H)

    for layer in range(n_layers):
        w_ih, w_hh, b = params["lstm"][layer]
        ys = []
        for d, reverse in ((0, False), (1, True)):
            w_i = w_ih[:, d * G:(d + 1) * G]
            w_h = w_hh[d]
            bias = b[:, d * G:(d + 1) * G]
            h = h0[2 * layer + d]
            c = c0[2 * layer + d]
            y = jnp.zeros((T, B, H), jnp.float32)
            t_order = range(T - 1, -1, -1) if reverse else range(T)
            for t in t_order:
                h_new, c_new = cell(x[t], h, c, w_i, w_h, bias)
                mask = (t < lens)[:, None]
                h = jnp.where(mask, h_new, h)
                c = jnp.where(mask, c_new, c)
                y = y.at[t].set(jnp.where(mask, h_new, 0.0))
            ys.append(y)
        x = jnp.concatenate(ys, axis=-1)

    last = x[lens - 1, jnp.arange(B), :]
    w_t, b_t = params["heads"][num_task]
    return jax.nn.softmax(mm(last, w_t) + b_t, axis=-1)


# ----------------------------------------------------------------------------
if __name__ == "__main__":
    T, B = 8, 4
    feature_size = 16
    n_hidden = 32
    n_layers = 2
    n_classes = 5
    nT = 3
    num_task = 1

    key = jax.random.PRNGKey(0)
    key, k_param, k_x, k_c0 = jax.random.split(key, 4)

    params = init_params(k_param, n_input=feature_size, n_hidden=n_hidden,
                         n_layers=n_layers, n_classes=n_classes, nT=nT)

    input_seq = jax.random.normal(k_x, (T, B, feature_size), dtype=jnp.float32)
    # pack_padded_sequence requires lengths sorted in decreasing order (> 0)
    input_len = jnp.array([8, 6, 5, 3], dtype=jnp.int32)

    # init_hidden: h0 = zeros, c0 = randn (deterministic here)
    h0 = jnp.zeros((n_layers * 2, B, n_hidden), dtype=jnp.float32)
    c0 = jax.random.normal(k_c0, (n_layers * 2, B, n_hidden), dtype=jnp.float32)

    probs = mtl_net_forward(params, input_seq, input_len, num_task,
                            h0, c0, n_layers)
    probs = jax.block_until_ready(probs)

    # Tight parity check against a reference using the same bf16 MXU numerics;
    # loose sanity check against the pure-f32 reference (bf16 matmul rounding).
    ref_bf16 = mtl_net_reference(params, input_seq, input_len, num_task,
                                 h0, c0, n_layers, matmul_dtype=jnp.bfloat16)
    ref_f32 = mtl_net_reference(params, input_seq, input_len, num_task,
                                h0, c0, n_layers, matmul_dtype=jnp.float32)

    assert probs.shape == (B, n_classes)
    assert bool(jnp.all(jnp.isfinite(probs)))
    assert bool(jnp.allclose(jnp.sum(probs, axis=1), 1.0, atol=5e-3))
    assert bool(jnp.allclose(probs, ref_bf16, atol=1e-2, rtol=2e-2))
    assert bool(jnp.allclose(probs, ref_f32, atol=8e-2, rtol=1e-1))
    print("KERNEL_OK")
</pallas_src>

<mosaic_0001>
module attributes {stable_mosaic.version = 11 : i64} {
  func.func @_bilstm_layer_kernel(%arg0: memref<8x1xi32, #tpu.memory_space<vmem>>, %arg1: memref<8x8x16xbf16, #tpu.memory_space<vmem>>, %arg2: memref<1x16x256xbf16, #tpu.memory_space<vmem>>, %arg3: memref<2x8x32xf32, #tpu.memory_space<vmem>>, %arg4: memref<2x8x32xf32, #tpu.memory_space<vmem>>, %arg5: memref<2x32x128xbf16, #tpu.memory_space<vmem>>, %arg6: memref<1x256xf32, #tpu.memory_space<vmem>>, %arg7: memref<8x8x32xbf16, #tpu.memory_space<vmem>>, %arg8: memref<8x8x32xbf16, #tpu.memory_space<vmem>>, %arg9: memref<8x8x128xf32, #tpu.memory_space<vmem>>, %arg10: memref<8x8x128xf32, #tpu.memory_space<vmem>>) attributes {dimension_semantics = [], scalar_prefetch = 0 : i64, scratch_operands = 2 : i64, tpu.core_type = #tpu.core_type<tc>} {
    %c0 = arith.constant 0 : index
    %c0_0 = arith.constant 0 : index
    %0 = vector.load %arg0[%c0, %c0_0] : memref<8x1xi32, #tpu.memory_space<vmem>>, vector<8x1xi32>
    %cst = arith.constant 0.000000e+00 : f32
    %1 = vector.broadcast %cst : f32 to vector<8x32xf32>
    %c0_1 = arith.constant 0 : index
    %c0_2 = arith.constant 0 : index
    %c0_3 = arith.constant 0 : index
    %2 = vector.load %arg5[%c0_1, %c0_2, %c0_3] : memref<2x32x128xbf16, #tpu.memory_space<vmem>>, vector<1x32x128xbf16>
    %3 = vector.shape_cast %2 : vector<1x32x128xbf16> to vector<32x128xbf16>
    %c1 = arith.constant 1 : index
    %c0_4 = arith.constant 0 : index
    %c0_5 = arith.constant 0 : index
    %4 = vector.load %arg5[%c1, %c0_4, %c0_5] : memref<2x32x128xbf16, #tpu.memory_space<vmem>>, vector<1x32x128xbf16>
    %5 = vector.shape_cast %4 : vector<1x32x128xbf16> to vector<32x128xbf16>
    %c0_6 = arith.constant 0 : index
    %c0_7 = arith.constant 0 : index
    %c0_8 = arith.constant 0 : index
    %6 = vector.load %arg1[%c0_6, %c0_7, %c0_8] : memref<8x8x16xbf16, #tpu.memory_space<vmem>>, vector<8x8x16xbf16>
    %7 = vector.shape_cast %6 : vector<8x8x16xbf16> to vector<64x16xbf16>
    %c0_9 = arith.constant 0 : index
    %c0_10 = arith.constant 0 : index
    %c0_11 = arith.constant 0 : index
    %8 = vector.load %arg2[%c0_9, %c0_10, %c0_11] : memref<1x16x256xbf16, #tpu.memory_space<vmem>>, vector<1x16x256xbf16>
    %9 = vector.shape_cast %8 : vector<1x16x256xbf16> to vector<16x256xbf16>
    %cst_12 = arith.constant dense<0.000000e+00> : vector<64x256xf32>
    %10 = tpu.matmul %7, %9, %cst_12 {dimension_numbers = #tpu.dot_dimension_numbers<[1], [0], [0], [1], [0, 0, 1, 1], [], []>} : vector<64x16xbf16>, vector<16x256xbf16>, vector<64x256xf32> -> vector<64x256xf32>
    %c0_13 = arith.constant 0 : index
    %c0_14 = arith.constant 0 : index
    %11 = vector.load %arg6[%c0_13, %c0_14] : memref<1x256xf32, #tpu.memory_space<vmem>>, vector<1x256xf32>
    %12 = vector.broadcast %11 : vector<1x256xf32> to vector<64x256xf32>
    %13 = arith.addf %10, %12 : vector<64x256xf32>
    %14 = vector.shape_cast %13 : vector<64x256xf32> to vector<8x8x256xf32>
    %15 = vector.extract_strided_slice %14 {offsets = [0, 0, 0], sizes = [8, 8, 128], strides = [1, 1, 1]} : vector<8x8x256xf32> to vector<8x8x128xf32>
    %c0_15 = arith.constant 0 : index
    %c0_16 = arith.constant 0 : index
    %c0_17 = arith.constant 0 : index
    %16 = vector.load %arg9[%c0_15, %c0_16, %c0_17] : memref<8x8x128xf32, #tpu.memory_space<vmem>>, vector<8x8x128xf32>
    tpu.vector_store %arg9[%c0_15, %c0_16, %c0_17], %15 {strides = array<i32>} : memref<8x8x128xf32, #tpu.memory_space<vmem>>, vector<8x8x128xf32>,
    %17 = vector.extract_strided_slice %14 {offsets = [0, 0, 128], sizes = [8, 8, 128], strides = [1, 1, 1]} : vector<8x8x256xf32> to vector<8x8x128xf32>
    %c0_18 = arith.constant 0 : index
    %c0_19 = arith.constant 0 : index
    %c0_20 = arith.constant 0 : index
    %18 = vector.load %arg10[%c0_18, %c0_19, %c0_20] : memref<8x8x128xf32, #tpu.memory_space<vmem>>, vector<8x8x128xf32>
    tpu.vector_store %arg10[%c0_18, %c0_19, %c0_20], %17 {strides = array<i32>} : memref<8x8x128xf32, #tpu.memory_space<vmem>>, vector<8x8x128xf32>,
    %c0_21 = arith.constant 0 : index
    %c0_22 = arith.constant 0 : index
    %c0_23 = arith.constant 0 : index
    %19 = vector.load %arg3[%c0_21, %c0_22, %c0_23] : memref<2x8x32xf32, #tpu.memory_space<vmem>>, vector<1x8x32xf32>
    %20 = vector.shape_cast %19 : vector<1x8x32xf32> to vector<8x32xf32>
    %c0_24 = arith.constant 0 : index
    %c0_25 = arith.constant 0 : index
    %c0_26 = arith.constant 0 : index
    %21 = vector.load %arg4[%c0_24, %c0_25, %c0_26] : memref<2x8x32xf32, #tpu.memory_space<vmem>>, vector<1x8x32xf32>
    %22 = vector.shape_cast %21 : vector<1x8x32xf32> to vector<8x32xf32>
    %c0_i32 = arith.constant 0 : i32
    %23 = arith.index_cast %c0_i32 : i32 to index
    %c0_27 = arith.constant 0 : index
    %c0_28 = arith.constant 0 : index
    %24 = vector.load %arg9[%23, %c0_27, %c0_28] : memref<8x8x128xf32, #tpu.memory_space<vmem>>, vector<1x8x128xf32>
    %25 = vector.shape_cast %24 : vector<1x8x128xf32> to vector<8x128xf32>
    %26 = arith.truncf %20 : vector<8x32xf32> to vector<8x32xbf16>
    %cst_29 = arith.constant dense<0.000000e+00> : vector<8x128xf32>
    %27 = tpu.matmul %26, %3, %cst_29 {dimension_numbers = #tpu.dot_dimension_numbers<[1], [0], [0], [1], [0, 0, 1, 1], [], []>} : vector<8x32xbf16>, vector<32x128xbf16>, vector<8x128xf32> -> vector<8x128xf32>
    %28 = arith.addf %25, %27 : vector<8x128xf32>
    %29 = vector.extract_strided_slice %28 {offsets = [0, 0], sizes = [8, 32], strides = [1, 1]} : vector<8x128xf32> to vector<8x32xf32>
    %30 = arith.negf %29 : vector<8x32xf32>
    %31 = math.exp %30 : vector<8x32xf32>
    %cst_30 = arith.constant 1.000000e+00 : f32
    %32 = vector.broadcast %cst_30 : f32 to vector<8x32xf32>
    %33 = arith.addf %32, %31 : vector<8x32xf32>
    %34 = arith.divf %32, %33 : vector<8x32xf32>
    %35 = vector.extract_strided_slice %28 {offsets = [0, 32], sizes = [8, 32], strides = [1, 1]} : vector<8x128xf32> to vector<8x32xf32>
    %36 = arith.negf %35 : vector<8x32xf32>
    %37 = math.exp %36 : vector<8x32xf32>
    %cst_31 = arith.constant 1.000000e+00 : f32
    %38 = vector.broadcast %cst_31 : f32 to vector<8x32xf32>
    %39 = arith.addf %38, %37 : vector<8x32xf32>
    %40 = arith.divf %38, %39 : vector<8x32xf32>
    %41 = vector.extract_strided_slice %28 {offsets = [0, 64], sizes = [8, 32], strides = [1, 1]} : vector<8x128xf32> to vector<8x32xf32>
    %42 = math.tanh %41 : vector<8x32xf32>
    %43 = vector.extract_strided_slice %28 {offsets = [0, 96], sizes = [8, 32], strides = [1, 1]} : vector<8x128xf32> to vector<8x32xf32>
    %44 = arith.negf %43 : vector<8x32xf32>
    %45 = math.exp %44 : vector<8x32xf32>
    %cst_32 = arith.constant 1.000000e+00 : f32
    %46 = vector.broadcast %cst_32 : f32 to vector<8x32xf32>
    %47 = arith.addf %46, %45 : vector<8x32xf32>
    %48 = arith.divf %46, %47 : vector<8x32xf32>
    %49 = arith.mulf %40, %22 : vector<8x32xf32>
    %50 = arith.mulf %34, %42 : vector<8x32xf32>
    %51 = arith.addf %49, %50 : vector<8x32xf32>
    %52 = math.tanh %51 : vector<8x32xf32>
    %53 = arith.mulf %48, %52 : vector<8x32xf32>
    %54 = vector.broadcast %c0_i32 : i32 to vector<8x1xi32>
    %55 = arith.cmpi slt, %54, %0 : vector<8x1xi32>
    %56 = vector.shape_cast %55 : vector<8x1xi1> to vector<8x1xi1>
    %57 = vector.broadcast %56 : vector<8x1xi1> to vector<8x32xi1>
    %58 = arith.select %57, %53, %1 : vector<8x32xi1>, vector<8x32xf32>
    %59 = arith.truncf %58 : vector<8x32xf32> to vector<8x32xbf16>
    %60 = arith.index_cast %c0_i32 : i32 to index
    %c0_33 = arith.constant 0 : index
    %c0_34 = arith.constant 0 : index
    %61 = vector.load %arg7[%60, %c0_33, %c0_34] : memref<8x8x32xbf16, #tpu.memory_space<vmem>>, vector<1x8x32xbf16>
    %62 = vector.shape_cast %61 : vector<1x8x32xbf16> to vector<8x32xbf16>
    %63 = vector.shape_cast %59 : vector<8x32xbf16> to vector<1x8x32xbf16>
    tpu.vector_store %arg7[%60, %c0_33, %c0_34], %63 {strides = array<i32>} : memref<8x8x32xbf16, #tpu.memory_space<vmem>>, vector<1x8x32xbf16>,
    %64 = vector.shape_cast %55 : vector<8x1xi1> to vector<8x1xi1>
    %65 = vector.broadcast %64 : vector<8x1xi1> to vector<8x32xi1>
    %66 = arith.select %65, %53, %20 : vector<8x32xi1>, vector<8x32xf32>
    %67 = vector.shape_cast %55 : vector<8x1xi1> to vector<8x1xi1>
    %68 = vector.broadcast %67 : vector<8x1xi1> to vector<8x32xi1>
    %69 = arith.select %68, %51, %22 : vector<8x32xi1>, vector<8x32xf32>
    %c1_i32 = arith.constant 1 : i32
    %70 = arith.index_cast %c1_i32 : i32 to index
    %c0_35 = arith.constant 0 : index
    %c0_36 = arith.constant 0 : index
    %71 = vector.load %arg9[%70, %c0_35, %c0_36] : memref<8x8x128xf32, #tpu.memory_space<vmem>>, vector<1x8x128xf32>
    %72 = vector.shape_cast %71 : vector<1x8x128xf32> to vector<8x128xf32>
    %73 = arith.truncf %66 : vector<8x32xf32> to vector<8x32xbf16>
    %cst_37 = arith.constant dense<0.000000e+00> : vector<8x128xf32>
    %74 = tpu.matmul %73, %3, %cst_37 {dimension_numbers = #tpu.dot_dimension_numbers<[1], [0], [0], [1], [0, 0, 1, 1], [], []>} : vector<8x32xbf16>, vector<32x128xbf16>, vector<8x128xf32> -> vector<8x128xf32>
    %75 = arith.addf %72, %74 : vector<8x128xf32>
    %76 = vector.extract_strided_slice %75 {offsets = [0, 0], sizes = [8, 32], strides = [1, 1]} : vector<8x128xf32> to vector<8x32xf32>
    %77 = arith.negf %76 : vector<8x32xf32>
    %78 = math.exp %77 : vector<8x32xf32>
    %cst_38 = arith.constant 1.000000e+00 : f32
    %79 = vector.broadcast %cst_38 : f32 to vector<8x32xf32>
    %80 = arith.addf %79, %78 : vector<8x32xf32>
    %81 = arith.divf %79, %80 : vector<8x32xf32>
    %82 = vector.extract_strided_slice %75 {offsets = [0, 32], sizes = [8, 32], strides = [1, 1]} : vector<8x128xf32> to vector<8x32xf32>
    %83 = arith.negf %82 : vector<8x32xf32>
    %84 = math.exp %83 : vector<8x32xf32>
    %cst_39 = arith.constant 1.000000e+00 : f32
    %85 = vector.broadcast %cst_39 : f32 to vector<8x32xf32>
    %86 = arith.addf %85, %84 : vector<8x32xf32>
    %87 = arith.divf %85, %86 : vector<8x32xf32>
    %88 = vector.extract_strided_slice %75 {offsets = [0, 64], sizes = [8, 32], strides = [1, 1]} : vector<8x128xf32> to vector<8x32xf32>
    %89 = math.tanh %88 : vector<8x32xf32>
    %90 = vector.extract_strided_slice %75 {offsets = [0, 96], sizes = [8, 32], strides = [1, 1]} : vector<8x128xf32> to vector<8x32xf32>
    %91 = arith.negf %90 : vector<8x32xf32>
    %92 = math.exp %91 : vector<8x32xf32>
    %cst_40 = arith.constant 1.000000e+00 : f32
    %93 = vector.broadcast %cst_40 : f32 to vector<8x32xf32>
    %94 = arith.addf %93, %92 : vector<8x32xf32>
    %95 = arith.divf %93, %94 : vector<8x32xf32>
    %96 = arith.mulf %87, %69 : vector<8x32xf32>
    %97 = arith.mulf %81, %89 : vector<8x32xf32>
    %98 = arith.addf %96, %97 : vector<8x32xf32>
    %99 = math.tanh %98 : vector<8x32xf32>
    %100 = arith.mulf %95, %99 : vector<8x32xf32>
    %101 = vector.broadcast %c1_i32 : i32 to vector<8x1xi32>
    %102 = arith.cmpi slt, %101, %0 : vector<8x1xi32>
    %103 = vector.shape_cast %102 : vector<8x1xi1> to vector<8x1xi1>
    %104 = vector.broadcast %103 : vector<8x1xi1> to vector<8x32xi1>
    %105 = arith.select %104, %100, %1 : vector<8x32xi1>, vector<8x32xf32>
    %106 = arith.truncf %105 : vector<8x32xf32> to vector<8x32xbf16>
    %107 = arith.index_cast %c1_i32 : i32 to index
    %c0_41 = arith.constant 0 : index
    %c0_42 = arith.constant 0 : index
    %108 = vector.load %arg7[%107, %c0_41, %c0_42] : memref<8x8x32xbf16, #tpu.memory_space<vmem>>, vector<1x8x32xbf16>
    %109 = vector.shape_cast %108 : vector<1x8x32xbf16> to vector<8x32xbf16>
    %110 = vector.shape_cast %106 : vector<8x32xbf16> to vector<1x8x32xbf16>
    tpu.vector_store %arg7[%107, %c0_41, %c0_42], %110 {strides = array<i32>} : memref<8x8x32xbf16, #tpu.memory_space<vmem>>, vector<1x8x32xbf16>,
    %111 = vector.shape_cast %102 : vector<8x1xi1> to vector<8x1xi1>
    %112 = vector.broadcast %111 : vector<8x1xi1> to vector<8x32xi1>
    %113 = arith.select %112, %100, %66 : vector<8x32xi1>, vector<8x32xf32>
    %114 = vector.shape_cast %102 : vector<8x1xi1> to vector<8x1xi1>
    %115 = vector.broadcast %114 : vector<8x1xi1> to vector<8x32xi1>
    %116 = arith.select %115, %98, %69 : vector<8x32xi1>, vector<8x32xf32>
    %c2_i32 = arith.constant 2 : i32
    %117 = arith.index_cast %c2_i32 : i32 to index
    %c0_43 = arith.constant 0 : index
    %c0_44 = arith.constant 0 : index
    %118 = vector.load %arg9[%117, %c0_43, %c0_44] : memref<8x8x128xf32, #tpu.memory_space<vmem>>, vector<1x8x128xf32>
    %119 = vector.shape_cast %118 : vector<1x8x128xf32> to vector<8x128xf32>
    %120 = arith.truncf %113 : vector<8x32xf32> to vector<8x32xbf16>
    %cst_45 = arith.constant dense<0.000000e+00> : vector<8x128xf32>
    %121 = tpu.matmul %120, %3, %cst_45 {dimension_numbers = #tpu.dot_dimension_numbers<[1], [0], [0], [1], [0, 0, 1, 1], [], []>} : vector<8x32xbf16>, vector<32x128xbf16>, vector<8x128xf32> -> vector<8x128xf32>
    %122 = arith.addf %119, %121 : vector<8x128xf32>
    %123 = vector.extract_strided_slice %122 {offsets = [0, 0], sizes = [8, 32], strides = [1, 1]} : vector<8x128xf32> to vector<8x32xf32>
    %124 = arith.negf %123 : vector<8x32xf32>
    %125 = math.exp %124 : vector<8x32xf32>
    %cst_46 = arith.constant 1.000000e+00 : f32
    %126 = vector.broadcast %cst_46 : f32 to vector<8x32xf32>
    %127 = arith.addf %126, %125 : vector<8x32xf32>
    %128 = arith.divf %126, %127 : vector<8x32xf32>
    %129 = vector.extract_strided_slice %122 {offsets = [0, 32], sizes = [8, 32], strides = [1, 1]} : vector<8x128xf32> to vector<8x32xf32>
    %130 = arith.negf %129 : vector<8x32xf32>
    %131 = math.exp %130 : vector<8x32xf32>
    %cst_47 = arith.constant 1.000000e+00 : f32
    %132 = vector.broadcast %cst_47 : f32 to vector<8x32xf32>
    %133 = arith.addf %132, %131 : vector<8x32xf32>
    %134 = arith.divf %132, %133 : vector<8x32xf32>
    %135 = vector.extract_strided_slice %122 {offsets = [0, 64], sizes = [8, 32], strides = [1, 1]} : vector<8x128xf32> to vector<8x32xf32>
    %136 = math.tanh %135 : vector<8x32xf32>
    %137 = vector.extract_strided_slice %122 {offsets = [0, 96], sizes = [8, 32], strides = [1, 1]} : vector<8x128xf32> to vector<8x32xf32>
    %138 = arith.negf %137 : vector<8x32xf32>
    %139 = math.exp %138 : vector<8x32xf32>
    %cst_48 = arith.constant 1.000000e+00 : f32
    %140 = vector.broadcast %cst_48 : f32 to vector<8x32xf32>
    %141 = arith.addf %140, %139 : vector<8x32xf32>
    %142 = arith.divf %140, %141 : vector<8x32xf32>
    %143 = arith.mulf %134, %116 : vector<8x32xf32>
    %144 = arith.mulf %128, %136 : vector<8x32xf32>
    %145 = arith.addf %143, %144 : vector<8x32xf32>
    %146 = math.tanh %145 : vector<8x32xf32>
    %147 = arith.mulf %142, %146 : vector<8x32xf32>
    %148 = vector.broadcast %c2_i32 : i32 to vector<8x1xi32>
    %149 = arith.cmpi slt, %148, %0 : vector<8x1xi32>
    %150 = vector.shape_cast %149 : vector<8x1xi1> to vector<8x1xi1>
    %151 = vector.broadcast %150 : vector<8x1xi1> to vector<8x32xi1>
    %152 = arith.select %151, %147, %1 : vector<8x32xi1>, vector<8x32xf32>
    %153 = arith.truncf %152 : vector<8x32xf32> to vector<8x32xbf16>
    %154 = arith.index_cast %c2_i32 : i32 to index
    %c0_49 = arith.constant 0 : index
    %c0_50 = arith.constant 0 : index
    %155 = vector.load %arg7[%154, %c0_49, %c0_50] : memref<8x8x32xbf16, #tpu.memory_space<vmem>>, vector<1x8x32xbf16>
    %156 = vector.shape_cast %155 : vector<1x8x32xbf16> to vector<8x32xbf16>
    %157 = vector.shape_cast %153 : vector<8x32xbf16> to vector<1x8x32xbf16>
    tpu.vector_store %arg7[%154, %c0_49, %c0_50], %157 {strides = array<i32>} : memref<8x8x32xbf16, #tpu.memory_space<vmem>>, vector<1x8x32xbf16>,
    %158 = vector.shape_cast %149 : vector<8x1xi1> to vector<8x1xi1>
    %159 = vector.broadcast %158 : vector<8x1xi1> to vector<8x32xi1>
    %160 = arith.select %159, %147, %113 : vector<8x32xi1>, vector<8x32xf32>
    %161 = vector.shape_cast %149 : vector<8x1xi1> to vector<8x1xi1>
    %162 = vector.broadcast %161 : vector<8x1xi1> to vector<8x32xi1>
    %163 = arith.select %162, %145, %116 : vector<8x32xi1>, vector<8x32xf32>
    %c3_i32 = arith.constant 3 : i32
    %164 = arith.index_cast %c3_i32 : i32 to index
    %c0_51 = arith.constant 0 : index
    %c0_52 = arith.constant 0 : index
    %165 = vector.load %arg9[%164, %c0_51, %c0_52] : memref<8x8x128xf32, #tpu.memory_space<vmem>>, vector<1x8x128xf32>
    %166 = vector.shape_cast %165 : vector<1x8x128xf32> to vector<8x128xf32>
    %167 = arith.truncf %160 : vector<8x32xf32> to vector<8x32xbf16>
    %cst_53 = arith.constant dense<0.000000e+00> : vector<8x128xf32>
    %168 = tpu.matmul %167, %3, %cst_53 {dimension_numbers = #tpu.dot_dimension_numbers<[1], [0], [0], [1], [0, 0, 1, 1], [], []>} : vector<8x32xbf16>, vector<32x128xbf16>, vector<8x128xf32> -> vector<8x128xf32>
    %169 = arith.addf %166, %168 : vector<8x128xf32>
    %170 = vector.extract_strided_slice %169 {offsets = [0, 0], sizes = [8, 32], strides = [1, 1]} : vector<8x128xf32> to vector<8x32xf32>
    %171 = arith.negf %170 : vector<8x32xf32>
    %172 = math.exp %171 : vector<8x32xf32>
    %cst_54 = arith.constant 1.000000e+00 : f32
    %173 = vector.broadcast %cst_54 : f32 to vector<8x32xf32>
    %174 = arith.addf %173, %172 : vector<8x32xf32>
    %175 = arith.divf %173, %174 : vector<8x32xf32>
    %176 = vector.extract_strided_slice %169 {offsets = [0, 32], sizes = [8, 32], strides = [1, 1]} : vector<8x128xf32> to vector<8x32xf32>
    %177 = arith.negf %176 : vector<8x32xf32>
    %178 = math.exp %177 : vector<8x32xf32>
    %cst_55 = arith.constant 1.000000e+00 : f32
    %179 = vector.broadcast %cst_55 : f32 to vector<8x32xf32>
    %180 = arith.addf %179, %178 : vector<8x32xf32>
    %181 = arith.divf %179, %180 : vector<8x32xf32>
    %182 = vector.extract_strided_slice %169 {offsets = [0, 64], sizes = [8, 32], strides = [1, 1]} : vector<8x128xf32> to vector<8x32xf32>
    %183 = math.tanh %182 : vector<8x32xf32>
    %184 = vector.extract_strided_slice %169 {offsets = [0, 96], sizes = [8, 32], strides = [1, 1]} : vector<8x128xf32> to vector<8x32xf32>
    %185 = arith.negf %184 : vector<8x32xf32>
    %186 = math.exp %185 : vector<8x32xf32>
    %cst_56 = arith.constant 1.000000e+00 : f32
    %187 = vector.broadcast %cst_56 : f32 to vector<8x32xf32>
    %188 = arith.addf %187, %186 : vector<8x32xf32>
    %189 = arith.divf %187, %188 : vector<8x32xf32>
    %190 = arith.mulf %181, %163 : vector<8x32xf32>
    %191 = arith.mulf %175, %183 : vector<8x32xf32>
    %192 = arith.addf %190, %191 : vector<8x32xf32>
    %193 = math.tanh %192 : vector<8x32xf32>
    %194 = arith.mulf %189, %193 : vector<8x32xf32>
    %195 = vector.broadcast %c3_i32 : i32 to vector<8x1xi32>
    %196 = arith.cmpi slt, %195, %0 : vector<8x1xi32>
    %197 = vector.shape_cast %196 : vector<8x1xi1> to vector<8x1xi1>
    %198 = vector.broadcast %197 : vector<8x1xi1> to vector<8x32xi1>
    %199 = arith.select %198, %194, %1 : vector<8x32xi1>, vector<8x32xf32>
    %200 = arith.truncf %199 : vector<8x32xf32> to vector<8x32xbf16>
    %201 = arith.index_cast %c3_i32 : i32 to index
    %c0_57 = arith.constant 0 : index
    %c0_58 = arith.constant 0 : index
    %202 = vector.load %arg7[%201, %c0_57, %c0_58] : memref<8x8x32xbf16, #tpu.memory_space<vmem>>, vector<1x8x32xbf16>
    %203 = vector.shape_cast %202 : vector<1x8x32xbf16> to vector<8x32xbf16>
    %204 = vector.shape_cast %200 : vector<8x32xbf16> to vector<1x8x32xbf16>
    tpu.vector_store %arg7[%201, %c0_57, %c0_58], %204 {strides = array<i32>} : memref<8x8x32xbf16, #tpu.memory_space<vmem>>, vector<1x8x32xbf16>,
    %205 = vector.shape_cast %196 : vector<8x1xi1> to vector<8x1xi1>
    %206 = vector.broadcast %205 : vector<8x1xi1> to vector<8x32xi1>
    %207 = arith.select %206, %194, %160 : vector<8x32xi1>, vector<8x32xf32>
    %208 = vector.shape_cast %196 : vector<8x1xi1> to vector<8x1xi1>
    %209 = vector.broadcast %208 : vector<8x1xi1> to vector<8x32xi1>
    %210 = arith.select %209, %192, %163 : vector<8x32xi1>, vector<8x32xf32>
    %c4_i32 = arith.constant 4 : i32
    %211 = arith.index_cast %c4_i32 : i32 to index
    %c0_59 = arith.constant 0 : index
    %c0_60 = arith.constant 0 : index
    %212 = vector.load %arg9[%211, %c0_59, %c0_60] : memref<8x8x128xf32, #tpu.memory_space<vmem>>, vector<1x8x128xf32>
    %213 = vector.shape_cast %212 : vector<1x8x128xf32> to vector<8x128xf32>
    %214 = arith.truncf %207 : vector<8x32xf32> to vector<8x32xbf16>
    %cst_61 = arith.constant dense<0.000000e+00> : vector<8x128xf32>
    %215 = tpu.matmul %214, %3, %cst_61 {dimension_numbers = #tpu.dot_dimension_numbers<[1], [0], [0], [1], [0, 0, 1, 1], [], []>} : vector<8x32xbf16>, vector<32x128xbf16>, vector<8x128xf32> -> vector<8x128xf32>
    %216 = arith.addf %213, %215 : vector<8x128xf32>
    %217 = vector.extract_strided_slice %216 {offsets = [0, 0], sizes = [8, 32], strides = [1, 1]} : vector<8x128xf32> to vector<8x32xf32>
    %218 = arith.negf %217 : vector<8x32xf32>
    %219 = math.exp %218 : vector<8x32xf32>
    %cst_62 = arith.constant 1.000000e+00 : f32
    %220 = vector.broadcast %cst_62 : f32 to vector<8x32xf32>
    %221 = arith.addf %220, %219 : vector<8x32xf32>
    %222 = arith.divf %220, %221 : vector<8x32xf32>
    %223 = vector.extract_strided_slice %216 {offsets = [0, 32], sizes = [8, 32], strides = [1, 1]} : vector<8x128xf32> to vector<8x32xf32>
    %224 = arith.negf %223 : vector<8x32xf32>
    %225 = math.exp %224 : vector<8x32xf32>
    %cst_63 = arith.constant 1.000000e+00 : f32
    %226 = vector.broadcast %cst_63 : f32 to vector<8x32xf32>
    %227 = arith.addf %226, %225 : vector<8x32xf32>
    %228 = arith.divf %226, %227 : vector<8x32xf32>
    %229 = vector.extract_strided_slice %216 {offsets = [0, 64], sizes = [8, 32], strides = [1, 1]} : vector<8x128xf32> to vector<8x32xf32>
    %230 = math.tanh %229 : vector<8x32xf32>
    %231 = vector.extract_strided_slice %216 {offsets = [0, 96], sizes = [8, 32], strides = [1, 1]} : vector<8x128xf32> to vector<8x32xf32>
    %232 = arith.negf %231 : vector<8x32xf32>
    %233 = math.exp %232 : vector<8x32xf32>
    %cst_64 = arith.constant 1.000000e+00 : f32
    %234 = vector.broadcast %cst_64 : f32 to vector<8x32xf32>
    %235 = arith.addf %234, %233 : vector<8x32xf32>
    %236 = arith.divf %234, %235 : vector<8x32xf32>
    %237 = arith.mulf %228, %210 : vector<8x32xf32>
    %238 = arith.mulf %222, %230 : vector<8x32xf32>
    %239 = arith.addf %237, %238 : vector<8x32xf32>
    %240 = math.tanh %239 : vector<8x32xf32>
    %241 = arith.mulf %236, %240 : vector<8x32xf32>
    %242 = vector.broadcast %c4_i32 : i32 to vector<8x1xi32>
    %243 = arith.cmpi slt, %242, %0 : vector<8x1xi32>
    %244 = vector.shape_cast %243 : vector<8x1xi1> to vector<8x1xi1>
    %245 = vector.broadcast %244 : vector<8x1xi1> to vector<8x32xi1>
    %246 = arith.select %245, %241, %1 : vector<8x32xi1>, vector<8x32xf32>
    %247 = arith.truncf %246 : vector<8x32xf32> to vector<8x32xbf16>
    %248 = arith.index_cast %c4_i32 : i32 to index
    %c0_65 = arith.constant 0 : index
    %c0_66 = arith.constant 0 : index
    %249 = vector.load %arg7[%248, %c0_65, %c0_66] : memref<8x8x32xbf16, #tpu.memory_space<vmem>>, vector<1x8x32xbf16>
    %250 = vector.shape_cast %249 : vector<1x8x32xbf16> to vector<8x32xbf16>
    %251 = vector.shape_cast %247 : vector<8x32xbf16> to vector<1x8x32xbf16>
    tpu.vector_store %arg7[%248, %c0_65, %c0_66], %251 {strides = array<i32>} : memref<8x8x32xbf16, #tpu.memory_space<vmem>>, vector<1x8x32xbf16>,
    %252 = vector.shape_cast %243 : vector<8x1xi1> to vector<8x1xi1>
    %253 = vector.broadcast %252 : vector<8x1xi1> to vector<8x32xi1>
    %254 = arith.select %253, %241, %207 : vector<8x32xi1>, vector<8x32xf32>
    %255 = vector.shape_cast %243 : vector<8x1xi1> to vector<8x1xi1>
    %256 = vector.broadcast %255 : vector<8x1xi1> to vector<8x32xi1>
    %257 = arith.select %256, %239, %210 : vector<8x32xi1>, vector<8x32xf32>
    %c5_i32 = arith.constant 5 : i32
    %258 = arith.index_cast %c5_i32 : i32 to index
    %c0_67 = arith.constant 0 : index
    %c0_68 = arith.constant 0 : index
    %259 = vector.load %arg9[%258, %c0_67, %c0_68] : memref<8x8x128xf32, #tpu.memory_space<vmem>>, vector<1x8x128xf32>
    %260 = vector.shape_cast %259 : vector<1x8x128xf32> to vector<8x128xf32>
    %261 = arith.truncf %254 : vector<8x32xf32> to vector<8x32xbf16>
    %cst_69 = arith.constant dense<0.000000e+00> : vector<8x128xf32>
    %262 = tpu.matmul %261, %3, %cst_69 {dimension_numbers = #tpu.dot_dimension_numbers<[1], [0], [0], [1], [0, 0, 1, 1], [], []>} : vector<8x32xbf16>, vector<32x128xbf16>, vector<8x128xf32> -> vector<8x128xf32>
    %263 = arith.addf %260, %262 : vector<8x128xf32>
    %264 = vector.extract_strided_slice %263 {offsets = [0, 0], sizes = [8, 32], strides = [1, 1]} : vector<8x128xf32> to vector<8x32xf32>
    %265 = arith.negf %264 : vector<8x32xf32>
    %266 = math.exp %265 : vector<8x32xf32>
    %cst_70 = arith.constant 1.000000e+00 : f32
    %267 = vector.broadcast %cst_70 : f32 to vector<8x32xf32>
    %268 = arith.addf %267, %266 : vector<8x32xf32>
    %269 = arith.divf %267, %268 : vector<8x32xf32>
    %270 = vector.extract_strided_slice %263 {offsets = [0, 32], sizes = [8, 32], strides = [1, 1]} : vector<8x128xf32> to vector<8x32xf32>
    %271 = arith.negf %270 : vector<8x32xf32>
    %272 = math.exp %271 : vector<8x32xf32>
    %cst_71 = arith.constant 1.000000e+00 : f32
    %273 = vector.broadcast %cst_71 : f32 to vector<8x32xf32>
    %274 = arith.addf %273, %272 : vector<8x32xf32>
    %275 = arith.divf %273, %274 : vector<8x32xf32>
    %276 = vector.extract_strided_slice %263 {offsets = [0, 64], sizes = [8, 32], strides = [1, 1]} : vector<8x128xf32> to vector<8x32xf32>
    %277 = math.tanh %276 : vector<8x32xf32>
    %278 = vector.extract_strided_slice %263 {offsets = [0, 96], sizes = [8, 32], strides = [1, 1]} : vector<8x128xf32> to vector<8x32xf32>
    %279 = arith.negf %278 : vector<8x32xf32>
    %280 = math.exp %279 : vector<8x32xf32>
    %cst_72 = arith.constant 1.000000e+00 : f32
    %281 = vector.broadcast %cst_72 : f32 to vector<8x32xf32>
    %282 = arith.addf %281, %280 : vector<8x32xf32>
    %283 = arith.divf %281, %282 : vector<8x32xf32>
    %284 = arith.mulf %275, %257 : vector<8x32xf32>
    %285 = arith.mulf %269, %277 : vector<8x32xf32>
    %286 = arith.addf %284, %285 : vector<8x32xf32>
    %287 = math.tanh %286 : vector<8x32xf32>
    %288 = arith.mulf %283, %287 : vector<8x32xf32>
    %289 = vector.broadcast %c5_i32 : i32 to vector<8x1xi32>
    %290 = arith.cmpi slt, %289, %0 : vector<8x1xi32>
    %291 = vector.shape_cast %290 : vector<8x1xi1> to vector<8x1xi1>
    %292 = vector.broadcast %291 : vector<8x1xi1> to vector<8x32xi1>
    %293 = arith.select %292, %288, %1 : vector<8x32xi1>, vector<8x32xf32>
    %294 = arith.truncf %293 : vector<8x32xf32> to vector<8x32xbf16>
    %295 = arith.index_cast %c5_i32 : i32 to index
    %c0_73 = arith.constant 0 : index
    %c0_74 = arith.constant 0 : index
    %296 = vector.load %arg7[%295, %c0_73, %c0_74] : memref<8x8x32xbf16, #tpu.memory_space<vmem>>, vector<1x8x32xbf16>
    %297 = vector.shape_cast %296 : vector<1x8x32xbf16> to vector<8x32xbf16>
    %298 = vector.shape_cast %294 : vector<8x32xbf16> to vector<1x8x32xbf16>
    tpu.vector_store %arg7[%295, %c0_73, %c0_74], %298 {strides = array<i32>} : memref<8x8x32xbf16, #tpu.memory_space<vmem>>, vector<1x8x32xbf16>,
    %299 = vector.shape_cast %290 : vector<8x1xi1> to vector<8x1xi1>
    %300 = vector.broadcast %299 : vector<8x1xi1> to vector<8x32xi1>
    %301 = arith.select %300, %288, %254 : vector<8x32xi1>, vector<8x32xf32>
    %302 = vector.shape_cast %290 : vector<8x1xi1> to vector<8x1xi1>
    %303 = vector.broadcast %302 : vector<8x1xi1> to vector<8x32xi1>
    %304 = arith.select %303, %286, %257 : vector<8x32xi1>, vector<8x32xf32>
    %c6_i32 = arith.constant 6 : i32
    %305 = arith.index_cast %c6_i32 : i32 to index
    %c0_75 = arith.constant 0 : index
    %c0_76 = arith.constant 0 : index
    %306 = vector.load %arg9[%305, %c0_75, %c0_76] : memref<8x8x128xf32, #tpu.memory_space<vmem>>, vector<1x8x128xf32>
    %307 = vector.shape_cast %306 : vector<1x8x128xf32> to vector<8x128xf32>
    %308 = arith.truncf %301 : vector<8x32xf32> to vector<8x32xbf16>
    %cst_77 = arith.constant dense<0.000000e+00> : vector<8x128xf32>
    %309 = tpu.matmul %308, %3, %cst_77 {dimension_numbers = #tpu.dot_dimension_numbers<[1], [0], [0], [1], [0, 0, 1, 1], [], []>} : vector<8x32xbf16>, vector<32x128xbf16>, vector<8x128xf32> -> vector<8x128xf32>
    %310 = arith.addf %307, %309 : vector<8x128xf32>
    %311 = vector.extract_strided_slice %310 {offsets = [0, 0], sizes = [8, 32], strides = [1, 1]} : vector<8x128xf32> to vector<8x32xf32>
    %312 = arith.negf %311 : vector<8x32xf32>
    %313 = math.exp %312 : vector<8x32xf32>
    %cst_78 = arith.constant 1.000000e+00 : f32
    %314 = vector.broadcast %cst_78 : f32 to vector<8x32xf32>
    %315 = arith.addf %314, %313 : vector<8x32xf32>
    %316 = arith.divf %314, %315 : vector<8x32xf32>
    %317 = vector.extract_strided_slice %310 {offsets = [0, 32], sizes = [8, 32], strides = [1, 1]} : vector<8x128xf32> to vector<8x32xf32>
    %318 = arith.negf %317 : vector<8x32xf32>
    %319 = math.exp %318 : vector<8x32xf32>
    %cst_79 = arith.constant 1.000000e+00 : f32
    %320 = vector.broadcast %cst_79 : f32 to vector<8x32xf32>
    %321 = arith.addf %320, %319 : vector<8x32xf32>
    %322 = arith.divf %320, %321 : vector<8x32xf32>
    %323 = vector.extract_strided_slice %310 {offsets = [0, 64], sizes = [8, 32], strides = [1, 1]} : vector<8x128xf32> to vector<8x32xf32>
    %324 = math.tanh %323 : vector<8x32xf32>
    %325 = vector.extract_strided_slice %310 {offsets = [0, 96], sizes = [8, 32], strides = [1, 1]} : vector<8x128xf32> to vector<8x32xf32>
    %326 = arith.negf %325 : vector<8x32xf32>
    %327 = math.exp %326 : vector<8x32xf32>
    %cst_80 = arith.constant 1.000000e+00 : f32
    %328 = vector.broadcast %cst_80 : f32 to vector<8x32xf32>
    %329 = arith.addf %328, %327 : vector<8x32xf32>
    %330 = arith.divf %328, %329 : vector<8x32xf32>
    %331 = arith.mulf %322, %304 : vector<8x32xf32>
    %332 = arith.mulf %316, %324 : vector<8x32xf32>
    %333 = arith.addf %331, %332 : vector<8x32xf32>
    %334 = math.tanh %333 : vector<8x32xf32>
    %335 = arith.mulf %330, %334 : vector<8x32xf32>
    %336 = vector.broadcast %c6_i32 : i32 to vector<8x1xi32>
    %337 = arith.cmpi slt, %336, %0 : vector<8x1xi32>
    %338 = vector.shape_cast %337 : vector<8x1xi1> to vector<8x1xi1>
    %339 = vector.broadcast %338 : vector<8x1xi1> to vector<8x32xi1>
    %340 = arith.select %339, %335, %1 : vector<8x32xi1>, vector<8x32xf32>
    %341 = arith.truncf %340 : vector<8x32xf32> to vector<8x32xbf16>
    %342 = arith.index_cast %c6_i32 : i32 to index
    %c0_81 = arith.constant 0 : index
    %c0_82 = arith.constant 0 : index
    %343 = vector.load %arg7[%342, %c0_81, %c0_82] : memref<8x8x32xbf16, #tpu.memory_space<vmem>>, vector<1x8x32xbf16>
    %344 = vector.shape_cast %343 : vector<1x8x32xbf16> to vector<8x32xbf16>
    %345 = vector.shape_cast %341 : vector<8x32xbf16> to vector<1x8x32xbf16>
    tpu.vector_store %arg7[%342, %c0_81, %c0_82], %345 {strides = array<i32>} : memref<8x8x32xbf16, #tpu.memory_space<vmem>>, vector<1x8x32xbf16>,
    %346 = vector.shape_cast %337 : vector<8x1xi1> to vector<8x1xi1>
    %347 = vector.broadcast %346 : vector<8x1xi1> to vector<8x32xi1>
    %348 = arith.select %347, %335, %301 : vector<8x32xi1>, vector<8x32xf32>
    %349 = vector.shape_cast %337 : vector<8x1xi1> to vector<8x1xi1>
    %350 = vector.broadcast %349 : vector<8x1xi1> to vector<8x32xi1>
    %351 = arith.select %350, %333, %304 : vector<8x32xi1>, vector<8x32xf32>
    %c7_i32 = arith.constant 7 : i32
    %352 = arith.index_cast %c7_i32 : i32 to index
    %c0_83 = arith.constant 0 : index
    %c0_84 = arith.constant 0 : index
    %353 = vector.load %arg9[%352, %c0_83, %c0_84] : memref<8x8x128xf32, #tpu.memory_space<vmem>>, vector<1x8x128xf32>
    %354 = vector.shape_cast %353 : vector<1x8x128xf32> to vector<8x128xf32>
    %355 = arith.truncf %348 : vector<8x32xf32> to vector<8x32xbf16>
    %cst_85 = arith.constant dense<0.000000e+00> : vector<8x128xf32>
    %356 = tpu.matmul %355, %3, %cst_85 {dimension_numbers = #tpu.dot_dimension_numbers<[1], [0], [0], [1], [0, 0, 1, 1], [], []>} : vector<8x32xbf16>, vector<32x128xbf16>, vector<8x128xf32> -> vector<8x128xf32>
    %357 = arith.addf %354, %356 : vector<8x128xf32>
    %358 = vector.extract_strided_slice %357 {offsets = [0, 0], sizes = [8, 32], strides = [1, 1]} : vector<8x128xf32> to vector<8x32xf32>
    %359 = arith.negf %358 : vector<8x32xf32>
    %360 = math.exp %359 : vector<8x32xf32>
    %cst_86 = arith.constant 1.000000e+00 : f32
    %361 = vector.broadcast %cst_86 : f32 to vector<8x32xf32>
    %362 = arith.addf %361, %360 : vector<8x32xf32>
    %363 = arith.divf %361, %362 : vector<8x32xf32>
    %364 = vector.extract_strided_slice %357 {offsets = [0, 32], sizes = [8, 32], strides = [1, 1]} : vector<8x128xf32> to vector<8x32xf32>
    %365 = arith.negf %364 : vector<8x32xf32>
    %366 = math.exp %365 : vector<8x32xf32>
    %cst_87 = arith.constant 1.000000e+00 : f32
    %367 = vector.broadcast %cst_87 : f32 to vector<8x32xf32>
    %368 = arith.addf %367, %366 : vector<8x32xf32>
    %369 = arith.divf %367, %368 : vector<8x32xf32>
    %370 = vector.extract_strided_slice %357 {offsets = [0, 64], sizes = [8, 32], strides = [1, 1]} : vector<8x128xf32> to vector<8x32xf32>
    %371 = math.tanh %370 : vector<8x32xf32>
    %372 = vector.extract_strided_slice %357 {offsets = [0, 96], sizes = [8, 32], strides = [1, 1]} : vector<8x128xf32> to vector<8x32xf32>
    %373 = arith.negf %372 : vector<8x32xf32>
    %374 = math.exp %373 : vector<8x32xf32>
    %cst_88 = arith.constant 1.000000e+00 : f32
    %375 = vector.broadcast %cst_88 : f32 to vector<8x32xf32>
    %376 = arith.addf %375, %374 : vector<8x32xf32>
    %377 = arith.divf %375, %376 : vector<8x32xf32>
    %378 = arith.mulf %369, %351 : vector<8x32xf32>
    %379 = arith.mulf %363, %371 : vector<8x32xf32>
    %380 = arith.addf %378, %379 : vector<8x32xf32>
    %381 = math.tanh %380 : vector<8x32xf32>
    %382 = arith.mulf %377, %381 : vector<8x32xf32>
    %383 = vector.broadcast %c7_i32 : i32 to vector<8x1xi32>
    %384 = arith.cmpi slt, %383, %0 : vector<8x1xi32>
    %385 = vector.shape_cast %384 : vector<8x1xi1> to vector<8x1xi1>
    %386 = vector.broadcast %385 : vector<8x1xi1> to vector<8x32xi1>
    %387 = arith.select %386, %382, %1 : vector<8x32xi1>, vector<8x32xf32>
    %388 = arith.truncf %387 : vector<8x32xf32> to vector<8x32xbf16>
    %389 = arith.index_cast %c7_i32 : i32 to index
    %c0_89 = arith.constant 0 : index
    %c0_90 = arith.constant 0 : index
    %390 = vector.load %arg7[%389, %c0_89, %c0_90] : memref<8x8x32xbf16, #tpu.memory_space<vmem>>, vector<1x8x32xbf16>
    %391 = vector.shape_cast %390 : vector<1x8x32xbf16> to vector<8x32xbf16>
    %392 = vector.shape_cast %388 : vector<8x32xbf16> to vector<1x8x32xbf16>
    tpu.vector_store %arg7[%389, %c0_89, %c0_90], %392 {strides = array<i32>} : memref<8x8x32xbf16, #tpu.memory_space<vmem>>, vector<1x8x32xbf16>,
    %393 = vector.shape_cast %384 : vector<8x1xi1> to vector<8x1xi1>
    %394 = vector.broadcast %393 : vector<8x1xi1> to vector<8x32xi1>
    %395 = arith.select %394, %382, %348 : vector<8x32xi1>, vector<8x32xf32>
    %396 = vector.shape_cast %384 : vector<8x1xi1> to vector<8x1xi1>
    %397 = vector.broadcast %396 : vector<8x1xi1> to vector<8x32xi1>
    %398 = arith.select %397, %380, %351 : vector<8x32xi1>, vector<8x32xf32>
    %c8_i32 = arith.constant 8 : i32
    %c1_91 = arith.constant 1 : index
    %c0_92 = arith.constant 0 : index
    %c0_93 = arith.constant 0 : index
    %399 = vector.load %arg3[%c1_91, %c0_92, %c0_93] : memref<2x8x32xf32, #tpu.memory_space<vmem>>, vector<1x8x32xf32>
    %400 = vector.shape_cast %399 : vector<1x8x32xf32> to vector<8x32xf32>
    %c1_94 = arith.constant 1 : index
    %c0_95 = arith.constant 0 : index
    %c0_96 = arith.constant 0 : index
    %401 = vector.load %arg4[%c1_94, %c0_95, %c0_96] : memref<2x8x32xf32, #tpu.memory_space<vmem>>, vector<1x8x32xf32>
    %402 = vector.shape_cast %401 : vector<1x8x32xf32> to vector<8x32xf32>
    %c0_i32_97 = arith.constant 0 : i32
    %c7_i32_98 = arith.constant 7 : i32
    %403 = arith.subi %c7_i32_98, %c0_i32_97 : i32
    %404 = arith.index_cast %403 : i32 to index
    %c0_99 = arith.constant 0 : index
    %c0_100 = arith.constant 0 : index
    %405 = vector.load %arg10[%404, %c0_99, %c0_100] : memref<8x8x128xf32, #tpu.memory_space<vmem>>, vector<1x8x128xf32>
    %406 = vector.shape_cast %405 : vector<1x8x128xf32> to vector<8x128xf32>
    %407 = arith.truncf %400 : vector<8x32xf32> to vector<8x32xbf16>
    %cst_101 = arith.constant dense<0.000000e+00> : vector<8x128xf32>
    %408 = tpu.matmul %407, %5, %cst_101 {dimension_numbers = #tpu.dot_dimension_numbers<[1], [0], [0], [1], [0, 0, 1, 1], [], []>} : vector<8x32xbf16>, vector<32x128xbf16>, vector<8x128xf32> -> vector<8x128xf32>
    %409 = arith.addf %406, %408 : vector<8x128xf32>
    %410 = vector.extract_strided_slice %409 {offsets = [0, 0], sizes = [8, 32], strides = [1, 1]} : vector<8x128xf32> to vector<8x32xf32>
    %411 = arith.negf %410 : vector<8x32xf32>
    %412 = math.exp %411 : vector<8x32xf32>
    %cst_102 = arith.constant 1.000000e+00 : f32
    %413 = vector.broadcast %cst_102 : f32 to vector<8x32xf32>
    %414 = arith.addf %413, %412 : vector<8x32xf32>
    %415 = arith.divf %413, %414 : vector<8x32xf32>
    %416 = vector.extract_strided_slice %409 {offsets = [0, 32], sizes = [8, 32], strides = [1, 1]} : vector<8x128xf32> to vector<8x32xf32>
    %417 = arith.negf %416 : vector<8x32xf32>
    %418 = math.exp %417 : vector<8x32xf32>
    %cst_103 = arith.constant 1.000000e+00 : f32
    %419 = vector.broadcast %cst_103 : f32 to vector<8x32xf32>
    %420 = arith.addf %419, %418 : vector<8x32xf32>
    %421 = arith.divf %419, %420 : vector<8x32xf32>
    %422 = vector.extract_strided_slice %409 {offsets = [0, 64], sizes = [8, 32], strides = [1, 1]} : vector<8x128xf32> to vector<8x32xf32>
    %423 = math.tanh %422 : vector<8x32xf32>
    %424 = vector.extract_strided_slice %409 {offsets = [0, 96], sizes = [8, 32], strides = [1, 1]} : vector<8x128xf32> to vector<8x32xf32>
    %425 = arith.negf %424 : vector<8x32xf32>
    %426 = math.exp %425 : vector<8x32xf32>
    %cst_104 = arith.constant 1.000000e+00 : f32
    %427 = vector.broadcast %cst_104 : f32 to vector<8x32xf32>
    %428 = arith.addf %427, %426 : vector<8x32xf32>
    %429 = arith.divf %427, %428 : vector<8x32xf32>
    %430 = arith.mulf %421, %402 : vector<8x32xf32>
    %431 = arith.mulf %415, %423 : vector<8x32xf32>
    %432 = arith.addf %430, %431 : vector<8x32xf32>
    %433 = math.tanh %432 : vector<8x32xf32>
    %434 = arith.mulf %429, %433 : vector<8x32xf32>
    %435 = vector.broadcast %403 : i32 to vector<8x1xi32>
    %436 = arith.cmpi slt, %435, %0 : vector<8x1xi32>
    %437 = vector.shape_cast %436 : vector<8x1xi1> to vector<8x1xi1>
    %438 = vector.broadcast %437 : vector<8x1xi1> to vector<8x32xi1>
    %439 = arith.select %438, %434, %1 : vector<8x32xi1>, vector<8x32xf32>
    %440 = arith.truncf %439 : vector<8x32xf32> to vector<8x32xbf16>
    %441 = arith.index_cast %403 : i32 to index
    %c0_105 = arith.constant 0 : index
    %c0_106 = arith.constant 0 : index
    %442 = vector.load %arg8[%441, %c0_105, %c0_106] : memref<8x8x32xbf16, #tpu.memory_space<vmem>>, vector<1x8x32xbf16>
    %443 = vector.shape_cast %442 : vector<1x8x32xbf16> to vector<8x32xbf16>
    %444 = vector.shape_cast %440 : vector<8x32xbf16> to vector<1x8x32xbf16>
    tpu.vector_store %arg8[%441, %c0_105, %c0_106], %444 {strides = array<i32>} : memref<8x8x32xbf16, #tpu.memory_space<vmem>>, vector<1x8x32xbf16>,
    %445 = vector.shape_cast %436 : vector<8x1xi1> to vector<8x1xi1>
    %446 = vector.broadcast %445 : vector<8x1xi1> to vector<8x32xi1>
    %447 = arith.select %446, %434, %400 : vector<8x32xi1>, vector<8x32xf32>
    %448 = vector.shape_cast %436 : vector<8x1xi1> to vector<8x1xi1>
    %449 = vector.broadcast %448 : vector<8x1xi1> to vector<8x32xi1>
    %450 = arith.select %449, %432, %402 : vector<8x32xi1>, vector<8x32xf32>
    %c1_i32_107 = arith.constant 1 : i32
    %c7_i32_108 = arith.constant 7 : i32
    %451 = arith.subi %c7_i32_108, %c1_i32_107 : i32
    %452 = arith.index_cast %451 : i32 to index
    %c0_109 = arith.constant 0 : index
    %c0_110 = arith.constant 0 : index
    %453 = vector.load %arg10[%452, %c0_109, %c0_110] : memref<8x8x128xf32, #tpu.memory_space<vmem>>, vector<1x8x128xf32>
    %454 = vector.shape_cast %453 : vector<1x8x128xf32> to vector<8x128xf32>
    %455 = arith.truncf %447 : vector<8x32xf32> to vector<8x32xbf16>
    %cst_111 = arith.constant dense<0.000000e+00> : vector<8x128xf32>
    %456 = tpu.matmul %455, %5, %cst_111 {dimension_numbers = #tpu.dot_dimension_numbers<[1], [0], [0], [1], [0, 0, 1, 1], [], []>} : vector<8x32xbf16>, vector<32x128xbf16>, vector<8x128xf32> -> vector<8x128xf32>
    %457 = arith.addf %454, %456 : vector<8x128xf32>
    %458 = vector.extract_strided_slice %457 {offsets = [0, 0], sizes = [8, 32], strides = [1, 1]} : vector<8x128xf32> to vector<8x32xf32>
    %459 = arith.negf %458 : vector<8x32xf32>
    %460 = math.exp %459 : vector<8x32xf32>
    %cst_112 = arith.constant 1.000000e+00 : f32
    %461 = vector.broadcast %cst_112 : f32 to vector<8x32xf32>
    %462 = arith.addf %461, %460 : vector<8x32xf32>
    %463 = arith.divf %461, %462 : vector<8x32xf32>
    %464 = vector.extract_strided_slice %457 {offsets = [0, 32], sizes = [8, 32], strides = [1, 1]} : vector<8x128xf32> to vector<8x32xf32>
    %465 = arith.negf %464 : vector<8x32xf32>
    %466 = math.exp %465 : vector<8x32xf32>
    %cst_113 = arith.constant 1.000000e+00 : f32
    %467 = vector.broadcast %cst_113 : f32 to vector<8x32xf32>
    %468 = arith.addf %467, %466 : vector<8x32xf32>
    %469 = arith.divf %467, %468 : vector<8x32xf32>
    %470 = vector.extract_strided_slice %457 {offsets = [0, 64], sizes = [8, 32], strides = [1, 1]} : vector<8x128xf32> to vector<8x32xf32>
    %471 = math.tanh %470 : vector<8x32xf32>
    %472 = vector.extract_strided_slice %457 {offsets = [0, 96], sizes = [8, 32], strides = [1, 1]} : vector<8x128xf32> to vector<8x32xf32>
    %473 = arith.negf %472 : vector<8x32xf32>
    %474 = math.exp %473 : vector<8x32xf32>
    %cst_114 = arith.constant 1.000000e+00 : f32
    %475 = vector.broadcast %cst_114 : f32 to vector<8x32xf32>
    %476 = arith.addf %475, %474 : vector<8x32xf32>
    %477 = arith.divf %475, %476 : vector<8x32xf32>
    %478 = arith.mulf %469, %450 : vector<8x32xf32>
    %479 = arith.mulf %463, %471 : vector<8x32xf32>
    %480 = arith.addf %478, %479 : vector<8x32xf32>
    %481 = math.tanh %480 : vector<8x32xf32>
    %482 = arith.mulf %477, %481 : vector<8x32xf32>
    %483 = vector.broadcast %451 : i32 to vector<8x1xi32>
    %484 = arith.cmpi slt, %483, %0 : vector<8x1xi32>
    %485 = vector.shape_cast %484 : vector<8x1xi1> to vector<8x1xi1>
    %486 = vector.broadcast %485 : vector<8x1xi1> to vector<8x32xi1>
    %487 = arith.select %486, %482, %1 : vector<8x32xi1>, vector<8x32xf32>
    %488 = arith.truncf %487 : vector<8x32xf32> to vector<8x32xbf16>
    %489 = arith.index_cast %451 : i32 to index
    %c0_115 = arith.constant 0 : index
    %c0_116 = arith.constant 0 : index
    %490 = vector.load %arg8[%489, %c0_115, %c0_116] : memref<8x8x32xbf16, #tpu.memory_space<vmem>>, vector<1x8x32xbf16>
    %491 = vector.shape_cast %490 : vector<1x8x32xbf16> to vector<8x32xbf16>
    %492 = vector.shape_cast %488 : vector<8x32xbf16> to vector<1x8x32xbf16>
    tpu.vector_store %arg8[%489, %c0_115, %c0_116], %492 {strides = array<i32>} : memref<8x8x32xbf16, #tpu.memory_space<vmem>>, vector<1x8x32xbf16>,
    %493 = vector.shape_cast %484 : vector<8x1xi1> to vector<8x1xi1>
    %494 = vector.broadcast %493 : vector<8x1xi1> to vector<8x32xi1>
    %495 = arith.select %494, %482, %447 : vector<8x32xi1>, vector<8x32xf32>
    %496 = vector.shape_cast %484 : vector<8x1xi1> to vector<8x1xi1>
    %497 = vector.broadcast %496 : vector<8x1xi1> to vector<8x32xi1>
    %498 = arith.select %497, %480, %450 : vector<8x32xi1>, vector<8x32xf32>
    %c2_i32_117 = arith.constant 2 : i32
    %c7_i32_118 = arith.constant 7 : i32
    %499 = arith.subi %c7_i32_118, %c2_i32_117 : i32
    %500 = arith.index_cast %499 : i32 to index
    %c0_119 = arith.constant 0 : index
    %c0_120 = arith.constant 0 : index
    %501 = vector.load %arg10[%500, %c0_119, %c0_120] : memref<8x8x128xf32, #tpu.memory_space<vmem>>, vector<1x8x128xf32>
    %502 = vector.shape_cast %501 : vector<1x8x128xf32> to vector<8x128xf32>
    %503 = arith.truncf %495 : vector<8x32xf32> to vector<8x32xbf16>
    %cst_121 = arith.constant dense<0.000000e+00> : vector<8x128xf32>
    %504 = tpu.matmul %503, %5, %cst_121 {dimension_numbers = #tpu.dot_dimension_numbers<[1], [0], [0], [1], [0, 0, 1, 1], [], []>} : vector<8x32xbf16>, vector<32x128xbf16>, vector<8x128xf32> -> vector<8x128xf32>
    %505 = arith.addf %502, %504 : vector<8x128xf32>
    %506 = vector.extract_strided_slice %505 {offsets = [0, 0], sizes = [8, 32], strides = [1, 1]} : vector<8x128xf32> to vector<8x32xf32>
    %507 = arith.negf %506 : vector<8x32xf32>
    %508 = math.exp %507 : vector<8x32xf32>
    %cst_122 = arith.constant 1.000000e+00 : f32
    %509 = vector.broadcast %cst_122 : f32 to vector<8x32xf32>
    %510 = arith.addf %509, %508 : vector<8x32xf32>
    %511 = arith.divf %509, %510 : vector<8x32xf32>
    %512 = vector.extract_strided_slice %505 {offsets = [0, 32], sizes = [8, 32], strides = [1, 1]} : vector<8x128xf32> to vector<8x32xf32>
    %513 = arith.negf %512 : vector<8x32xf32>
    %514 = math.exp %513 : vector<8x32xf32>
    %cst_123 = arith.constant 1.000000e+00 : f32
    %515 = vector.broadcast %cst_123 : f32 to vector<8x32xf32>
    %516 = arith.addf %515, %514 : vector<8x32xf32>
    %517 = arith.divf %515, %516 : vector<8x32xf32>
    %518 = vector.extract_strided_slice %505 {offsets = [0, 64], sizes = [8, 32], strides = [1, 1]} : vector<8x128xf32> to vector<8x32xf32>
    %519 = math.tanh %518 : vector<8x32xf32>
    %520 = vector.extract_strided_slice %505 {offsets = [0, 96], sizes = [8, 32], strides = [1, 1]} : vector<8x128xf32> to vector<8x32xf32>
    %521 = arith.negf %520 : vector<8x32xf32>
    %522 = math.exp %521 : vector<8x32xf32>
    %cst_124 = arith.constant 1.000000e+00 : f32
    %523 = vector.broadcast %cst_124 : f32 to vector<8x32xf32>
    %524 = arith.addf %523, %522 : vector<8x32xf32>
    %525 = arith.divf %523, %524 : vector<8x32xf32>
    %526 = arith.mulf %517, %498 : vector<8x32xf32>
    %527 = arith.mulf %511, %519 : vector<8x32xf32>
    %528 = arith.addf %526, %527 : vector<8x32xf32>
    %529 = math.tanh %528 : vector<8x32xf32>
    %530 = arith.mulf %525, %529 : vector<8x32xf32>
    %531 = vector.broadcast %499 : i32 to vector<8x1xi32>
    %532 = arith.cmpi slt, %531, %0 : vector<8x1xi32>
    %533 = vector.shape_cast %532 : vector<8x1xi1> to vector<8x1xi1>
    %534 = vector.broadcast %533 : vector<8x1xi1> to vector<8x32xi1>
    %535 = arith.select %534, %530, %1 : vector<8x32xi1>, vector<8x32xf32>
    %536 = arith.truncf %535 : vector<8x32xf32> to vector<8x32xbf16>
    %537 = arith.index_cast %499 : i32 to index
    %c0_125 = arith.constant 0 : index
    %c0_126 = arith.constant 0 : index
    %538 = vector.load %arg8[%537, %c0_125, %c0_126] : memref<8x8x32xbf16, #tpu.memory_space<vmem>>, vector<1x8x32xbf16>
    %539 = vector.shape_cast %538 : vector<1x8x32xbf16> to vector<8x32xbf16>
    %540 = vector.shape_cast %536 : vector<8x32xbf16> to vector<1x8x32xbf16>
    tpu.vector_store %arg8[%537, %c0_125, %c0_126], %540 {strides = array<i32>} : memref<8x8x32xbf16, #tpu.memory_space<vmem>>, vector<1x8x32xbf16>,
    %541 = vector.shape_cast %532 : vector<8x1xi1> to vector<8x1xi1>
    %542 = vector.broadcast %541 : vector<8x1xi1> to vector<8x32xi1>
    %543 = arith.select %542, %530, %495 : vector<8x32xi1>, vector<8x32xf32>
    %544 = vector.shape_cast %532 : vector<8x1xi1> to vector<8x1xi1>
    %545 = vector.broadcast %544 : vector<8x1xi1> to vector<8x32xi1>
    %546 = arith.select %545, %528, %498 : vector<8x32xi1>, vector<8x32xf32>
    %c3_i32_127 = arith.constant 3 : i32
    %c7_i32_128 = arith.constant 7 : i32
    %547 = arith.subi %c7_i32_128, %c3_i32_127 : i32
    %548 = arith.index_cast %547 : i32 to index
    %c0_129 = arith.constant 0 : index
    %c0_130 = arith.constant 0 : index
    %549 = vector.load %arg10[%548, %c0_129, %c0_130] : memref<8x8x128xf32, #tpu.memory_space<vmem>>, vector<1x8x128xf32>
    %550 = vector.shape_cast %549 : vector<1x8x128xf32> to vector<8x128xf32>
    %551 = arith.truncf %543 : vector<8x32xf32> to vector<8x32xbf16>
    %cst_131 = arith.constant dense<0.000000e+00> : vector<8x128xf32>
    %552 = tpu.matmul %551, %5, %cst_131 {dimension_numbers = #tpu.dot_dimension_numbers<[1], [0], [0], [1], [0, 0, 1, 1], [], []>} : vector<8x32xbf16>, vector<32x128xbf16>, vector<8x128xf32> -> vector<8x128xf32>
    %553 = arith.addf %550, %552 : vector<8x128xf32>
    %554 = vector.extract_strided_slice %553 {offsets = [0, 0], sizes = [8, 32], strides = [1, 1]} : vector<8x128xf32> to vector<8x32xf32>
    %555 = arith.negf %554 : vector<8x32xf32>
    %556 = math.exp %555 : vector<8x32xf32>
    %cst_132 = arith.constant 1.000000e+00 : f32
    %557 = vector.broadcast %cst_132 : f32 to vector<8x32xf32>
    %558 = arith.addf %557, %556 : vector<8x32xf32>
    %559 = arith.divf %557, %558 : vector<8x32xf32>
    %560 = vector.extract_strided_slice %553 {offsets = [0, 32], sizes = [8, 32], strides = [1, 1]} : vector<8x128xf32> to vector<8x32xf32>
    %561 = arith.negf %560 : vector<8x32xf32>
    %562 = math.exp %561 : vector<8x32xf32>
    %cst_133 = arith.constant 1.000000e+00 : f32
    %563 = vector.broadcast %cst_133 : f32 to vector<8x32xf32>
    %564 = arith.addf %563, %562 : vector<8x32xf32>
    %565 = arith.divf %563, %564 : vector<8x32xf32>
    %566 = vector.extract_strided_slice %553 {offsets = [0, 64], sizes = [8, 32], strides = [1, 1]} : vector<8x128xf32> to vector<8x32xf32>
    %567 = math.tanh %566 : vector<8x32xf32>
    %568 = vector.extract_strided_slice %553 {offsets = [0, 96], sizes = [8, 32], strides = [1, 1]} : vector<8x128xf32> to vector<8x32xf32>
    %569 = arith.negf %568 : vector<8x32xf32>
    %570 = math.exp %569 : vector<8x32xf32>
    %cst_134 = arith.constant 1.000000e+00 : f32
    %571 = vector.broadcast %cst_134 : f32 to vector<8x32xf32>
    %572 = arith.addf %571, %570 : vector<8x32xf32>
    %573 = arith.divf %571, %572 : vector<8x32xf32>
    %574 = arith.mulf %565, %546 : vector<8x32xf32>
    %575 = arith.mulf %559, %567 : vector<8x32xf32>
    %576 = arith.addf %574, %575 : vector<8x32xf32>
    %577 = math.tanh %576 : vector<8x32xf32>
    %578 = arith.mulf %573, %577 : vector<8x32xf32>
    %579 = vector.broadcast %547 : i32 to vector<8x1xi32>
    %580 = arith.cmpi slt, %579, %0 : vector<8x1xi32>
    %581 = vector.shape_cast %580 : vector<8x1xi1> to vector<8x1xi1>
    %582 = vector.broadcast %581 : vector<8x1xi1> to vector<8x32xi1>
    %583 = arith.select %582, %578, %1 : vector<8x32xi1>, vector<8x32xf32>
    %584 = arith.truncf %583 : vector<8x32xf32> to vector<8x32xbf16>
    %585 = arith.index_cast %547 : i32 to index
    %c0_135 = arith.constant 0 : index
    %c0_136 = arith.constant 0 : index
    %586 = vector.load %arg8[%585, %c0_135, %c0_136] : memref<8x8x32xbf16, #tpu.memory_space<vmem>>, vector<1x8x32xbf16>
    %587 = vector.shape_cast %586 : vector<1x8x32xbf16> to vector<8x32xbf16>
    %588 = vector.shape_cast %584 : vector<8x32xbf16> to vector<1x8x32xbf16>
    tpu.vector_store %arg8[%585, %c0_135, %c0_136], %588 {strides = array<i32>} : memref<8x8x32xbf16, #tpu.memory_space<vmem>>, vector<1x8x32xbf16>,
    %589 = vector.shape_cast %580 : vector<8x1xi1> to vector<8x1xi1>
    %590 = vector.broadcast %589 : vector<8x1xi1> to vector<8x32xi1>
    %591 = arith.select %590, %578, %543 : vector<8x32xi1>, vector<8x32xf32>
    %592 = vector.shape_cast %580 : vector<8x1xi1> to vector<8x1xi1>
    %593 = vector.broadcast %592 : vector<8x1xi1> to vector<8x32xi1>
    %594 = arith.select %593, %576, %546 : vector<8x32xi1>, vector<8x32xf32>
    %c4_i32_137 = arith.constant 4 : i32
    %c7_i32_138 = arith.constant 7 : i32
    %595 = arith.subi %c7_i32_138, %c4_i32_137 : i32
    %596 = arith.index_cast %595 : i32 to index
    %c0_139 = arith.constant 0 : index
    %c0_140 = arith.constant 0 : index
    %597 = vector.load %arg10[%596, %c0_139, %c0_140] : memref<8x8x128xf32, #tpu.memory_space<vmem>>, vector<1x8x128xf32>
    %598 = vector.shape_cast %597 : vector<1x8x128xf32> to vector<8x128xf32>
    %599 = arith.truncf %591 : vector<8x32xf32> to vector<8x32xbf16>
    %cst_141 = arith.constant dense<0.000000e+00> : vector<8x128xf32>
    %600 = tpu.matmul %599, %5, %cst_141 {dimension_numbers = #tpu.dot_dimension_numbers<[1], [0], [0], [1], [0, 0, 1, 1], [], []>} : vector<8x32xbf16>, vector<32x128xbf16>, vector<8x128xf32> -> vector<8x128xf32>
    %601 = arith.addf %598, %600 : vector<8x128xf32>
    %602 = vector.extract_strided_slice %601 {offsets = [0, 0], sizes = [8, 32], strides = [1, 1]} : vector<8x128xf32> to vector<8x32xf32>
    %603 = arith.negf %602 : vector<8x32xf32>
    %604 = math.exp %603 : vector<8x32xf32>
    %cst_142 = arith.constant 1.000000e+00 : f32
    %605 = vector.broadcast %cst_142 : f32 to vector<8x32xf32>
    %606 = arith.addf %605, %604 : vector<8x32xf32>
    %607 = arith.divf %605, %606 : vector<8x32xf32>
    %608 = vector.extract_strided_slice %601 {offsets = [0, 32], sizes = [8, 32], strides = [1, 1]} : vector<8x128xf32> to vector<8x32xf32>
    %609 = arith.negf %608 : vector<8x32xf32>
    %610 = math.exp %609 : vector<8x32xf32>
    %cst_143 = arith.constant 1.000000e+00 : f32
    %611 = vector.broadcast %cst_143 : f32 to vector<8x32xf32>
    %612 = arith.addf %611, %610 : vector<8x32xf32>
    %613 = arith.divf %611, %612 : vector<8x32xf32>
    %614 = vector.extract_strided_slice %601 {offsets = [0, 64], sizes = [8, 32], strides = [1, 1]} : vector<8x128xf32> to vector<8x32xf32>
    %615 = math.tanh %614 : vector<8x32xf32>
    %616 = vector.extract_strided_slice %601 {offsets = [0, 96], sizes = [8, 32], strides = [1, 1]} : vector<8x128xf32> to vector<8x32xf32>
    %617 = arith.negf %616 : vector<8x32xf32>
    %618 = math.exp %617 : vector<8x32xf32>
    %cst_144 = arith.constant 1.000000e+00 : f32
    %619 = vector.broadcast %cst_144 : f32 to vector<8x32xf32>
    %620 = arith.addf %619, %618 : vector<8x32xf32>
    %621 = arith.divf %619, %620 : vector<8x32xf32>
    %622 = arith.mulf %613, %594 : vector<8x32xf32>
    %623 = arith.mulf %607, %615 : vector<8x32xf32>
    %624 = arith.addf %622, %623 : vector<8x32xf32>
    %625 = math.tanh %624 : vector<8x32xf32>
    %626 = arith.mulf %621, %625 : vector<8x32xf32>
    %627 = vector.broadcast %595 : i32 to vector<8x1xi32>
    %628 = arith.cmpi slt, %627, %0 : vector<8x1xi32>
    %629 = vector.shape_cast %628 : vector<8x1xi1> to vector<8x1xi1>
    %630 = vector.broadcast %629 : vector<8x1xi1> to vector<8x32xi1>
    %631 = arith.select %630, %626, %1 : vector<8x32xi1>, vector<8x32xf32>
    %632 = arith.truncf %631 : vector<8x32xf32> to vector<8x32xbf16>
    %633 = arith.index_cast %595 : i32 to index
    %c0_145 = arith.constant 0 : index
    %c0_146 = arith.constant 0 : index
    %634 = vector.load %arg8[%633, %c0_145, %c0_146] : memref<8x8x32xbf16, #tpu.memory_space<vmem>>, vector<1x8x32xbf16>
    %635 = vector.shape_cast %634 : vector<1x8x32xbf16> to vector<8x32xbf16>
    %636 = vector.shape_cast %632 : vector<8x32xbf16> to vector<1x8x32xbf16>
    tpu.vector_store %arg8[%633, %c0_145, %c0_146], %636 {strides = array<i32>} : memref<8x8x32xbf16, #tpu.memory_space<vmem>>, vector<1x8x32xbf16>,
    %637 = vector.shape_cast %628 : vector<8x1xi1> to vector<8x1xi1>
    %638 = vector.broadcast %637 : vector<8x1xi1> to vector<8x32xi1>
    %639 = arith.select %638, %626, %591 : vector<8x32xi1>, vector<8x32xf32>
    %640 = vector.shape_cast %628 : vector<8x1xi1> to vector<8x1xi1>
    %641 = vector.broadcast %640 : vector<8x1xi1> to vector<8x32xi1>
    %642 = arith.select %641, %624, %594 : vector<8x32xi1>, vector<8x32xf32>
    %c5_i32_147 = arith.constant 5 : i32
    %c7_i32_148 = arith.constant 7 : i32
    %643 = arith.subi %c7_i32_148, %c5_i32_147 : i32
    %644 = arith.index_cast %643 : i32 to index
    %c0_149 = arith.constant 0 : index
    %c0_150 = arith.constant 0 : index
    %645 = vector.load %arg10[%644, %c0_149, %c0_150] : memref<8x8x128xf32, #tpu.memory_space<vmem>>, vector<1x8x128xf32>
    %646 = vector.shape_cast %645 : vector<1x8x128xf32> to vector<8x128xf32>
    %647 = arith.truncf %639 : vector<8x32xf32> to vector<8x32xbf16>
    %cst_151 = arith.constant dense<0.000000e+00> : vector<8x128xf32>
    %648 = tpu.matmul %647, %5, %cst_151 {dimension_numbers = #tpu.dot_dimension_numbers<[1], [0], [0], [1], [0, 0, 1, 1], [], []>} : vector<8x32xbf16>, vector<32x128xbf16>, vector<8x128xf32> -> vector<8x128xf32>
    %649 = arith.addf %646, %648 : vector<8x128xf32>
    %650 = vector.extract_strided_slice %649 {offsets = [0, 0], sizes = [8, 32], strides = [1, 1]} : vector<8x128xf32> to vector<8x32xf32>
    %651 = arith.negf %650 : vector<8x32xf32>
    %652 = math.exp %651 : vector<8x32xf32>
    %cst_152 = arith.constant 1.000000e+00 : f32
    %653 = vector.broadcast %cst_152 : f32 to vector<8x32xf32>
    %654 = arith.addf %653, %652 : vector<8x32xf32>
    %655 = arith.divf %653, %654 : vector<8x32xf32>
    %656 = vector.extract_strided_slice %649 {offsets = [0, 32], sizes = [8, 32], strides = [1, 1]} : vector<8x128xf32> to vector<8x32xf32>
    %657 = arith.negf %656 : vector<8x32xf32>
    %658 = math.exp %657 : vector<8x32xf32>
    %cst_153 = arith.constant 1.000000e+00 : f32
    %659 = vector.broadcast %cst_153 : f32 to vector<8x32xf32>
    %660 = arith.addf %659, %658 : vector<8x32xf32>
    %661 = arith.divf %659, %660 : vector<8x32xf32>
    %662 = vector.extract_strided_slice %649 {offsets = [0, 64], sizes = [8, 32], strides = [1, 1]} : vector<8x128xf32> to vector<8x32xf32>
    %663 = math.tanh %662 : vector<8x32xf32>
    %664 = vector.extract_strided_slice %649 {offsets = [0, 96], sizes = [8, 32], strides = [1, 1]} : vector<8x128xf32> to vector<8x32xf32>
    %665 = arith.negf %664 : vector<8x32xf32>
    %666 = math.exp %665 : vector<8x32xf32>
    %cst_154 = arith.constant 1.000000e+00 : f32
    %667 = vector.broadcast %cst_154 : f32 to vector<8x32xf32>
    %668 = arith.addf %667, %666 : vector<8x32xf32>
    %669 = arith.divf %667, %668 : vector<8x32xf32>
    %670 = arith.mulf %661, %642 : vector<8x32xf32>
    %671 = arith.mulf %655, %663 : vector<8x32xf32>
    %672 = arith.addf %670, %671 : vector<8x32xf32>
    %673 = math.tanh %672 : vector<8x32xf32>
    %674 = arith.mulf %669, %673 : vector<8x32xf32>
    %675 = vector.broadcast %643 : i32 to vector<8x1xi32>
    %676 = arith.cmpi slt, %675, %0 : vector<8x1xi32>
    %677 = vector.shape_cast %676 : vector<8x1xi1> to vector<8x1xi1>
    %678 = vector.broadcast %677 : vector<8x1xi1> to vector<8x32xi1>
    %679 = arith.select %678, %674, %1 : vector<8x32xi1>, vector<8x32xf32>
    %680 = arith.truncf %679 : vector<8x32xf32> to vector<8x32xbf16>
    %681 = arith.index_cast %643 : i32 to index
    %c0_155 = arith.constant 0 : index
    %c0_156 = arith.constant 0 : index
    %682 = vector.load %arg8[%681, %c0_155, %c0_156] : memref<8x8x32xbf16, #tpu.memory_space<vmem>>, vector<1x8x32xbf16>
    %683 = vector.shape_cast %682 : vector<1x8x32xbf16> to vector<8x32xbf16>
    %684 = vector.shape_cast %680 : vector<8x32xbf16> to vector<1x8x32xbf16>
    tpu.vector_store %arg8[%681, %c0_155, %c0_156], %684 {strides = array<i32>} : memref<8x8x32xbf16, #tpu.memory_space<vmem>>, vector<1x8x32xbf16>,
    %685 = vector.shape_cast %676 : vector<8x1xi1> to vector<8x1xi1>
    %686 = vector.broadcast %685 : vector<8x1xi1> to vector<8x32xi1>
    %687 = arith.select %686, %674, %639 : vector<8x32xi1>, vector<8x32xf32>
    %688 = vector.shape_cast %676 : vector<8x1xi1> to vector<8x1xi1>
    %689 = vector.broadcast %688 : vector<8x1xi1> to vector<8x32xi1>
    %690 = arith.select %689, %672, %642 : vector<8x32xi1>, vector<8x32xf32>
    %c6_i32_157 = arith.constant 6 : i32
    %c7_i32_158 = arith.constant 7 : i32
    %691 = arith.subi %c7_i32_158, %c6_i32_157 : i32
    %692 = arith.index_cast %691 : i32 to index
    %c0_159 = arith.constant 0 : index
    %c0_160 = arith.constant 0 : index
    %693 = vector.load %arg10[%692, %c0_159, %c0_160] : memref<8x8x128xf32, #tpu.memory_space<vmem>>, vector<1x8x128xf32>
    %694 = vector.shape_cast %693 : vector<1x8x128xf32> to vector<8x128xf32>
    %695 = arith.truncf %687 : vector<8x32xf32> to vector<8x32xbf16>
    %cst_161 = arith.constant dense<0.000000e+00> : vector<8x128xf32>
    %696 = tpu.matmul %695, %5, %cst_161 {dimension_numbers = #tpu.dot_dimension_numbers<[1], [0], [0], [1], [0, 0, 1, 1], [], []>} : vector<8x32xbf16>, vector<32x128xbf16>, vector<8x128xf32> -> vector<8x128xf32>
    %697 = arith.addf %694, %696 : vector<8x128xf32>
    %698 = vector.extract_strided_slice %697 {offsets = [0, 0], sizes = [8, 32], strides = [1, 1]} : vector<8x128xf32> to vector<8x32xf32>
    %699 = arith.negf %698 : vector<8x32xf32>
    %700 = math.exp %699 : vector<8x32xf32>
    %cst_162 = arith.constant 1.000000e+00 : f32
    %701 = vector.broadcast %cst_162 : f32 to vector<8x32xf32>
    %702 = arith.addf %701, %700 : vector<8x32xf32>
    %703 = arith.divf %701, %702 : vector<8x32xf32>
    %704 = vector.extract_strided_slice %697 {offsets = [0, 32], sizes = [8, 32], strides = [1, 1]} : vector<8x128xf32> to vector<8x32xf32>
    %705 = arith.negf %704 : vector<8x32xf32>
    %706 = math.exp %705 : vector<8x32xf32>
    %cst_163 = arith.constant 1.000000e+00 : f32
    %707 = vector.broadcast %cst_163 : f32 to vector<8x32xf32>
    %708 = arith.addf %707, %706 : vector<8x32xf32>
    %709 = arith.divf %707, %708 : vector<8x32xf32>
    %710 = vector.extract_strided_slice %697 {offsets = [0, 64], sizes = [8, 32], strides = [1, 1]} : vector<8x128xf32> to vector<8x32xf32>
    %711 = math.tanh %710 : vector<8x32xf32>
    %712 = vector.extract_strided_slice %697 {offsets = [0, 96], sizes = [8, 32], strides = [1, 1]} : vector<8x128xf32> to vector<8x32xf32>
    %713 = arith.negf %712 : vector<8x32xf32>
    %714 = math.exp %713 : vector<8x32xf32>
    %cst_164 = arith.constant 1.000000e+00 : f32
    %715 = vector.broadcast %cst_164 : f32 to vector<8x32xf32>
    %716 = arith.addf %715, %714 : vector<8x32xf32>
    %717 = arith.divf %715, %716 : vector<8x32xf32>
    %718 = arith.mulf %709, %690 : vector<8x32xf32>
    %719 = arith.mulf %703, %711 : vector<8x32xf32>
    %720 = arith.addf %718, %719 : vector<8x32xf32>
    %721 = math.tanh %720 : vector<8x32xf32>
    %722 = arith.mulf %717, %721 : vector<8x32xf32>
    %723 = vector.broadcast %691 : i32 to vector<8x1xi32>
    %724 = arith.cmpi slt, %723, %0 : vector<8x1xi32>
    %725 = vector.shape_cast %724 : vector<8x1xi1> to vector<8x1xi1>
    %726 = vector.broadcast %725 : vector<8x1xi1> to vector<8x32xi1>
    %727 = arith.select %726, %722, %1 : vector<8x32xi1>, vector<8x32xf32>
    %728 = arith.truncf %727 : vector<8x32xf32> to vector<8x32xbf16>
    %729 = arith.index_cast %691 : i32 to index
    %c0_165 = arith.constant 0 : index
    %c0_166 = arith.constant 0 : index
    %730 = vector.load %arg8[%729, %c0_165, %c0_166] : memref<8x8x32xbf16, #tpu.memory_space<vmem>>, vector<1x8x32xbf16>
    %731 = vector.shape_cast %730 : vector<1x8x32xbf16> to vector<8x32xbf16>
    %732 = vector.shape_cast %728 : vector<8x32xbf16> to vector<1x8x32xbf16>
    tpu.vector_store %arg8[%729, %c0_165, %c0_166], %732 {strides = array<i32>} : memref<8x8x32xbf16, #tpu.memory_space<vmem>>, vector<1x8x32xbf16>,
    %733 = vector.shape_cast %724 : vector<8x1xi1> to vector<8x1xi1>
    %734 = vector.broadcast %733 : vector<8x1xi1> to vector<8x32xi1>
    %735 = arith.select %734, %722, %687 : vector<8x32xi1>, vector<8x32xf32>
    %736 = vector.shape_cast %724 : vector<8x1xi1> to vector<8x1xi1>
    %737 = vector.broadcast %736 : vector<8x1xi1> to vector<8x32xi1>
    %738 = arith.select %737, %720, %690 : vector<8x32xi1>, vector<8x32xf32>
    %c7_i32_167 = arith.constant 7 : i32
    %c7_i32_168 = arith.constant 7 : i32
    %739 = arith.subi %c7_i32_168, %c7_i32_167 : i32
    %740 = arith.index_cast %739 : i32 to index
    %c0_169 = arith.constant 0 : index
    %c0_170 = arith.constant 0 : index
    %741 = vector.load %arg10[%740, %c0_169, %c0_170] : memref<8x8x128xf32, #tpu.memory_space<vmem>>, vector<1x8x128xf32>
    %742 = vector.shape_cast %741 : vector<1x8x128xf32> to vector<8x128xf32>
    %743 = arith.truncf %735 : vector<8x32xf32> to vector<8x32xbf16>
    %cst_171 = arith.constant dense<0.000000e+00> : vector<8x128xf32>
    %744 = tpu.matmul %743, %5, %cst_171 {dimension_numbers = #tpu.dot_dimension_numbers<[1], [0], [0], [1], [0, 0, 1, 1], [], []>} : vector<8x32xbf16>, vector<32x128xbf16>, vector<8x128xf32> -> vector<8x128xf32>
    %745 = arith.addf %742, %744 : vector<8x128xf32>
    %746 = vector.extract_strided_slice %745 {offsets = [0, 0], sizes = [8, 32], strides = [1, 1]} : vector<8x128xf32> to vector<8x32xf32>
    %747 = arith.negf %746 : vector<8x32xf32>
    %748 = math.exp %747 : vector<8x32xf32>
    %cst_172 = arith.constant 1.000000e+00 : f32
    %749 = vector.broadcast %cst_172 : f32 to vector<8x32xf32>
    %750 = arith.addf %749, %748 : vector<8x32xf32>
    %751 = arith.divf %749, %750 : vector<8x32xf32>
    %752 = vector.extract_strided_slice %745 {offsets = [0, 32], sizes = [8, 32], strides = [1, 1]} : vector<8x128xf32> to vector<8x32xf32>
    %753 = arith.negf %752 : vector<8x32xf32>
    %754 = math.exp %753 : vector<8x32xf32>
    %cst_173 = arith.constant 1.000000e+00 : f32
    %755 = vector.broadcast %cst_173 : f32 to vector<8x32xf32>
    %756 = arith.addf %755, %754 : vector<8x32xf32>
    %757 = arith.divf %755, %756 : vector<8x32xf32>
    %758 = vector.extract_strided_slice %745 {offsets = [0, 64], sizes = [8, 32], strides = [1, 1]} : vector<8x128xf32> to vector<8x32xf32>
    %759 = math.tanh %758 : vector<8x32xf32>
    %760 = vector.extract_strided_slice %745 {offsets = [0, 96], sizes = [8, 32], strides = [1, 1]} : vector<8x128xf32> to vector<8x32xf32>
    %761 = arith.negf %760 : vector<8x32xf32>
    %762 = math.exp %761 : vector<8x32xf32>
    %cst_174 = arith.constant 1.000000e+00 : f32
    %763 = vector.broadcast %cst_174 : f32 to vector<8x32xf32>
    %764 = arith.addf %763, %762 : vector<8x32xf32>
    %765 = arith.divf %763, %764 : vector<8x32xf32>
    %766 = arith.mulf %757, %738 : vector<8x32xf32>
    %767 = arith.mulf %751, %759 : vector<8x32xf32>
    %768 = arith.addf %766, %767 : vector<8x32xf32>
    %769 = math.tanh %768 : vector<8x32xf32>
    %770 = arith.mulf %765, %769 : vector<8x32xf32>
    %771 = vector.broadcast %739 : i32 to vector<8x1xi32>
    %772 = arith.cmpi slt, %771, %0 : vector<8x1xi32>
    %773 = vector.shape_cast %772 : vector<8x1xi1> to vector<8x1xi1>
    %774 = vector.broadcast %773 : vector<8x1xi1> to vector<8x32xi1>
    %775 = arith.select %774, %770, %1 : vector<8x32xi1>, vector<8x32xf32>
    %776 = arith.truncf %775 : vector<8x32xf32> to vector<8x32xbf16>
    %777 = arith.index_cast %739 : i32 to index
    %c0_175 = arith.constant 0 : index
    %c0_176 = arith.constant 0 : index
    %778 = vector.load %arg8[%777, %c0_175, %c0_176] : memref<8x8x32xbf16, #tpu.memory_space<vmem>>, vector<1x8x32xbf16>
    %779 = vector.shape_cast %778 : vector<1x8x32xbf16> to vector<8x32xbf16>
    %780 = vector.shape_cast %776 : vector<8x32xbf16> to vector<1x8x32xbf16>
    tpu.vector_store %arg8[%777, %c0_175, %c0_176], %780 {strides = array<i32>} : memref<8x8x32xbf16, #tpu.memory_space<vmem>>, vector<1x8x32xbf16>,
    %781 = vector.shape_cast %772 : vector<8x1xi1> to vector<8x1xi1>
    %782 = vector.broadcast %781 : vector<8x1xi1> to vector<8x32xi1>
    %783 = arith.select %782, %770, %735 : vector<8x32xi1>, vector<8x32xf32>
    %784 = vector.shape_cast %772 : vector<8x1xi1> to vector<8x1xi1>
    %785 = vector.broadcast %784 : vector<8x1xi1> to vector<8x32xi1>
    %786 = arith.select %785, %768, %738 : vector<8x32xi1>, vector<8x32xf32>
    %c8_i32_177 = arith.constant 8 : i32
    return
  }
}

</mosaic_0001>

<bundles_post_ra>
// kernel: tpu_custom_call.1
= control target key start
LH: loop header
LB: loop body
LE: loop exit
PB: predicated region body
PF: predicated region fallthrough
CT: control target
= control target key end

     0   :  { %14 = vsyncpa [#allocation5], 0  ;;  %s2974_s0 = inlined_call_operand.vmem [shape: s32[8,1], index: 0, kind: input, shape index: {}]   ;;  %s2975_s1 = inlined_call_operand.hbm [shape: bf16[8,8,16], index: 1, kind: input, shape index: {}]   ;;  %s2976_s2 = inlined_call_operand.vmem [shape: bf16[1,16,256], index: 2, kind: input, shape index: {}]   ;;  %s2977_s3 = inlined_call_operand.hbm [shape: f32[2,8,32], index: 3, kind: input, shape index: {}]   ;;  %s2978_s4 = inlined_call_operand.hbm [shape: f32[2,8,32], index: 4, kind: input, shape index: {}]   ;;  %s2979_s5 = inlined_call_operand.hbm [shape: bf16[2,32,128], index: 5, kind: input, shape index: {}]   ;;  %s2980_s6 = inlined_call_operand.vmem [shape: f32[1,256], index: 6, kind: input, shape index: {}]   ;;  %s2981_s7 = inlined_call_operand.hbm [shape: bf16[8,8,32], index: 7, kind: output, shape index: {0}]   ;;  %s2982_s8 = inlined_call_operand.hbm [shape: bf16[8,8,32], index: 8, kind: output, shape index: {1}]  }
   0x1   :  { %15 = vsyncpa [#allocation8], 0 }
   0x2   :  { %16 = vsyncpa [#allocation11], 0 }
   0x3   :  { %17 = vsyncpa [#allocation6], 0 }
   0x4   :  { %18 = vsyncpa [#allocation14], 0  ;;  %s2295_s27 = smov [#allocation7]   ;;  %s2153_s9 = scalar_lea.hbm %s2977_s3, 256 }
   0x5   :  { %s40_s28 = sshll.u32 %s2295_s27, 4  ;;  %p2154_p0 = scmp.ne.s32.totalorder %s2977_s3, %s2153_s9  ;;  %s41_s28 = int_to_ptr.vmem [resolvable:$true] %s40_s28 }
   0x6   :  { %p2157_p1 = scmp.lt.u32.totalorder %s2153_s9, %s2977_s3 }
   0x8   :  { %p2159_p2 = pnand %p2157_p1, %p2154_p0 }
   0xa   :  { %2162 = shalt.err (!%p2159_p2)
}
   0xb   :  { %s2163_s14 = scalar_lea.vmem %s41_s28, 256  ;;  %p2168_p4 = scmp.lt.s32.totalorder %s41_s28, %s41_s28 }
   0xc   :  { %p2164_p3 = scmp.ne.s32.totalorder %s41_s28, %s2163_s14  ;;  %p2169_p5 = scmp.lt.s32.totalorder %s2163_s14, %s2163_s14 }
   0xe   :  { %p2170_p6 = por %p2169_p5, %p2168_p4 }
  0x10   :  { %p2171_p7 = pnand %p2170_p6, %p2164_p3 }
  0x12   :  { %2174 = shalt.err (!%p2171_p7)
}
  0x13   :  { %s2296_s15 = smov 128   ;;  %s2297_s16 = smov 8  }
  0x14   :  { %46 = dma.hbm_to_vmem [thread:$0]  %s2977_s3, 256, %s41_s28, [#allocation8], %s2296_s15, %s2296_s15, %s2297_s16  }
  0x15   :  { %s2298_s19 = smov [#allocation4]   ;;  %s2175_s23 = scalar_lea.hbm %s2975_s1, 512 }
  0x16   :  { %s26_s20 = sshll.u32 %s2298_s19, 4  ;;  %p2176_p8 = scmp.ne.s32.totalorder %s2975_s1, %s2175_s23  ;;  %s27_s20 = int_to_ptr.vmem [resolvable:$true] %s26_s20 }
  0x17   :  { %p2179_p9 = scmp.lt.u32.totalorder %s2175_s23, %s2975_s1 }
  0x19   :  { %p2181_p10 = pnand %p2179_p9, %p2176_p8 }
  0x1b   :  { %2184 = shalt.err (!%p2181_p10)
}
  0x1c   :  { %s2185_s29 = scalar_lea.vmem %s27_s20, 512  ;;  %p2190_p12 = scmp.lt.s32.totalorder %s27_s20, %s27_s20 }
  0x1d   :  { %p2186_p11 = scmp.ne.s32.totalorder %s27_s20, %s2185_s29  ;;  %p2191_p13 = scmp.lt.s32.totalorder %s2185_s29, %s2185_s29 }
  0x1f   :  { %p2192_p0 = por %p2191_p13, %p2190_p12 }
  0x21   :  { %p2193_p1 = pnand %p2192_p0, %p2186_p11 }
  0x23   :  { %2196 = shalt.err (!%p2193_p1)
}
  0x24   :  { %s2299_s3 = smov 64   ;;  %s2300_s28 = smov 4  }
  0x25   :  { %32 = dma.hbm_to_vmem [thread:$0]  %s2975_s1, 512, %s27_s20, [#allocation5], %s2299_s3, %s2299_s3, %s2300_s28  }
  0x26   :  { %s2301_s10 = smov [#allocation9]   ;;  %s2302_s12 = smov [#allocation10]  }
  0x27   :  { %s52_s11 = sshll.u32 %s2301_s10, 4  ;;  %s64_s13 = sshll.u32 %s2302_s12, 4  ;;  %s53_s11 = int_to_ptr.vmem [resolvable:$true] %s52_s11  ;;  %s2385_s13 = int_to_ptr.vmem [resolvable:$true] %s64_s13 }
  0x28   :  { %s2197_s18 = scalar_lea.hbm %s2978_s4, 256 }
  0x29   :  { %p2198_p2 = scmp.ne.s32.totalorder %s2978_s4, %s2197_s18  ;;  %p2201_p3 = scmp.lt.u32.totalorder %s2197_s18, %s2978_s4 }
  0x2b   :  { %p2203_p4 = pnand %p2201_p3, %p2198_p2 }
  0x2d   :  { %2206 = shalt.err (!%p2203_p4)
}
  0x2e   :  { %s2207_s1 = scalar_lea.vmem %s53_s11, 256  ;;  %p2212_p6 = scmp.lt.s32.totalorder %s53_s11, %s53_s11 }
  0x2f   :  { %p2208_p5 = scmp.ne.s32.totalorder %s53_s11, %s2207_s1  ;;  %p2213_p7 = scmp.lt.s32.totalorder %s2207_s1, %s2207_s1 }
  0x31   :  { %p2214_p8 = por %p2213_p7, %p2212_p6 }
  0x33   :  { %p2215_p9 = pnand %p2214_p8, %p2208_p5 }
  0x35   :  { %2218 = shalt.err (!%p2215_p9)
}
  0x36   :  { %58 = dma.hbm_to_vmem [thread:$0]  %s2978_s4, 256, %s53_s11, [#allocation8], %s2296_s15, %s2296_s15, %s2297_s16  }
  0x37   :  { %s2219_s27 = scalar_lea.hbm %s2979_s5, 512 }
  0x38   :  { %p2220_p10 = scmp.ne.s32.totalorder %s2979_s5, %s2219_s27  ;;  %p2223_p11 = scmp.lt.u32.totalorder %s2219_s27, %s2979_s5 }
  0x3a   :  { %p2225_p12 = pnand %p2223_p11, %p2220_p10 }
  0x3c   :  { %2228 = shalt.err (!%p2225_p12)
}
  0x3d   :  { %s2229_s12 = scalar_lea.vmem %s2385_s13, 512  ;;  %p2234_p0 = scmp.lt.s32.totalorder %s2385_s13, %s2385_s13 }
  0x3e   :  { %p2230_p13 = scmp.ne.s32.totalorder %s2385_s13, %s2229_s12  ;;  %p2235_p1 = scmp.lt.s32.totalorder %s2229_s12, %s2229_s12 }
  0x40   :  { %p2236_p2 = por %p2235_p1, %p2234_p0 }
  0x42   :  { %p2237_p3 = pnand %p2236_p2, %p2230_p13 }
  0x44   :  { %2240 = shalt.err (!%p2237_p3)
}
  0x45   :  { %70 = dma.hbm_to_vmem [thread:$0]  %s2979_s5, 512, %s2385_s13, [#allocation11], %s2299_s3, %s2299_s3, %s2300_s28  }
  0x46   :  { %2285 = dma.done.wait [#allocation5], 512  }
  0x47   :  { %2286 = vsyncadd [#allocation5], 4294966784 }
  0x48   :  { %2287 = dma.done.wait [#allocation8], 512  }
  0x49   :  { %2288 = vsyncadd [#allocation8], 4294966784 }
  0x4a   :  { %2289 = dma.done.wait [#allocation11], 512  }
  0x4b   :  { %2290 = vsyncadd [#allocation11], 4294966784  ;;  %v2303_v0 = vmov 0.0   ;;  %v2304_v1 = vmov 0   ;;  %vm2305_vm0 = vmmov 0   ;;  %v2431_v3 = vld [vmem:[#allocation10] sm:$0xff]   ;;  %v108_v9 = vlaneseq }
  0x4c   :  { %1869 = vmatprep.subr.bf16.mxu1 %v2303_v0  ;;  %193 = vmatprep.mubr.bf16.mxu0 %v2304_v1  ;;  %v2014_v2 = vld [vmem:[%s2976_s2 + $0x4] ss:$8 sps:$4 sm:$0xff]   ;;  %v2017_v4 = vld [vmem:[%s2976_s2] ss:$8 sps:$4 sm:$0xff]   ;;  %v2018_v5 = vld [vmem:[#allocation4] sm:$0xff]   ;;  %vm148_vm1 = vcmask 130048  }
  0x4d   :  { %1873 = vmatprep.mubr.msk.bf16.mxu1 %vm2305_vm0, %v2303_v0  ;;  %2012 = vset.pattern.permute.xlu1 %v2304_v1  ;;  %v2438_v6 = vld [vmem:[#allocation10 + $0x8] sm:$0xff]   ;;  %v250_v7 = vld [vmem:[#allocation7] sm:$0xff]  ;;  %vm266_vm2 = vcmask 261120   ;;  %v2456_v10 = vshrl.u32 %v108_v9, 7  ;;  %v251_v25 = vld [vmem:[#allocation9] sm:$0xff]  ;;  %s2307_s19 = smov 96  }
  0x4e   :  { %2013 = vset.pattern.permute.xlu0 %v2304_v1  ;;  %161 = vmatprep.subr.bf16.mxu0 %v2014_v2  ;;  %v253_v8 = vpack.c.bf16 %v250_v7, %v250_v7  ;;  %v2462_v12 = vld [vmem:[%s2980_s6] sm:$0x3]  ;;  %s2306_s6 = smov 32  }
  0x4f   :  { %1870 = vmatpush3.bf16.msra.mxu1 %v2431_v3  ;;  %162 = vmatpush1.bf16.msra.mxu0 %v2017_v4  ;;  %v110_v11 = vsub.s32 0, %v2456_v10  ;;  %v2477_v29 = vld [vmem:[%s2974_s0] sm:$0xff]  ;;  %s2308_s0 = smov [#allocation12]  }
  0x50   :  { %1871 = vmatprep.subr.bf16.mxu1 %v2303_v0  ;;  %1901 = vmatprep.subr.bf16.mxu0 %v2303_v0  ;;  %vm339_vm3 = vcmp.gt.s32.totalorder %v2477_v29, 0  ;;  %vm435_vm5 = vcmp.gt.s32.totalorder %v2477_v29, 1  ;;  %v2020_v2 = vld [vmem:[#allocation4 + $0x8] sm:$0xff]   ;;  %vm527_vm7 = vcmp.gt.s32.totalorder %v2477_v29, 2  ;;  %vm619_vm9 = vcmp.gt.s32.totalorder %v2477_v29, 3  ;;  %s1713_s21 = sshll.u32 %s2308_s0, 4  ;;  %s1714_s21 = int_to_ptr.vmem [resolvable:$true] %s1713_s21 }
  0x51   :  { %v2465_v13 = vrot.slane %v2462_v12, %v110_v11  ;;  %v340_v33 = vsel %vm339_vm3, 1, %v2304_v1  ;;  %v436_v53 = vsel %vm435_vm5, 1, %v2304_v1  ;;  %vm711_vm11 = vcmp.gt.s32.totalorder %v2477_v29, 4  ;;  %s2241_s22 = scalar_lea.vmem %s1714_s21, 512  ;;  %p2246_p5 = scmp.lt.s32.totalorder %s1714_s21, %s1714_s21 }
  0x52   :  { %1749 = vmatmul.mubr.msk.bf16.vlgmr.msra.gmra.mrb[0].mxu0 %vm148_vm1, %v2018_v5  ;;  %vm803_vm13 = vcmp.gt.s32.totalorder %v2477_v29, 5  ;;  %vm895_vm15 = vcmp.gt.s32.totalorder %v2477_v29, 6  ;;  %p2242_p4 = scmp.ne.s32.totalorder %s1714_s21, %s2241_s22  ;;  %p2247_p6 = scmp.lt.s32.totalorder %s2241_s22, %s2241_s22 }
  0x53   :  { %1872 = vmatpush3.bf16.msra.mxu1 %v2438_v6  ;;  %203 = vmatprep.mubr.bf16.mxu0 %v2304_v1 }
  0x54   :  { %1877 = vmatprep.subr.bf16.mxu1 %v2303_v0  ;;  %1902 = vmatpush3.bf16.msra.mxu0 %v2431_v3  ;;  %p2248_p7 = por %p2247_p6, %p2246_p5 }
  0x55   :  { %1903 = vmatprep.subr.bf16.mxu0 %v2303_v0 }
  0x56   :  { %1874 = vmatmul.mubr.msk.bf16.vlgmr.msra.gmra.mrb[0].mxu1 %vm266_vm2, %v253_v8  ;;  %p2249_p8 = pnand %p2248_p7, %p2242_p4 }
  0x57   :  { %1878 = vmatpush3.bf16.msra.mxu1 %v2431_v3  ;;  %1881 = vmatprep.mubr.msk.bf16.mxu1 %vm2305_vm0, %v2303_v0 }
  0x58   :  { %1879 = vmatprep.subr.bf16.mxu1 %v2303_v0  ;;  %1904 = vmatpush3.bf16.msra.mxu0 %v2438_v6 }
  0x59   :  { %1917 = vmatprep.subr.bf16.mxu0 %v2303_v0 }
  0x5a   :  { %1750 = vmatmul.mubr.msk.bf16.gmra.mrb[4].mxu0 %vm148_vm1, %v2020_v2 }
  0x5b   :  { %1880 = vmatpush3.bf16.msra.mxu1 %v2438_v6  ;;  %213 = vmatprep.mubr.bf16.mxu0 %v2304_v1 }
  0x5c   :  { %1885 = vmatprep.subr.bf16.mxu1 %v2303_v0 }
 0x125   :  { %v195_v14 = vpop.f32.mrb[0].mxu0 }
 0x126   :  { %v196_v15 = vadd.f32 %v195_v14, %v2465_v13  ;;  %v2468_v16 = vpop.f32.mrb[1].mxu0 }
 0x127   :  { %v199_v17 = vpop.f32.mrb[2].mxu0 }
 0x128   :  { %v2470_v18 = vpop.f32.mrb[3].mxu0  ;;  %v200_v46 = vadd.f32 %v199_v17, %v2465_v13 }
 0x129   :  { %v304_v19 = vpop.f32.mrb[0].mxu1 }
 0x12a   :  { %v310_v20 = vadd.f32 %v304_v19, %v196_v15  ;;  %v1875_v21 = vpop.f32.mrb[1].mxu1 }
 0x12b   :  { %v307_v22 = vpop.f32.mrb[2].mxu1 }
 0x12c   :  { %v1876_v23 = vpop.f32.mrb[3].mxu1  ;;  %2025 = vtanh.f32 %v310_v20  ;;  %v1756_v26 = vmul.f32 -1.442695, %v310_v20 }
 0x12d   :  { %v205_v14 = vpop.f32.mrb[4].mxu0 }
 0x12e   :  { %2027 = vpow2.f32 %v1756_v26  ;;  %v2519_v15 = vpop.f32.mrb[5].mxu0  ;;  %v206_v21 = vadd.f32 %v205_v14, %v2465_v13 }
 0x12f   :  { %v209_v17 = vpop.f32.mrb[6].mxu0 }
 0x130   :  { %v2521_v19 = vpop.f32.mrb[7].mxu0 }
 0x136   :  { %v2026_v24 = vpop.eup %2025 }
 0x137   :  { %324 = vrot.lane.b32.xlu0 %v2026_v24, %s2299_s3 }
 0x138   :  { %v2028_v27 = vpop.eup %2027 }
 0x139   :  { %v314_v28 = vadd.f32 1.0, %v2028_v27 }
 0x13b   :  { %319 = vrot.lane.b32.xlu0 %v251_v25, %s2306_s6  ;;  %2029 = vrcp.f32 %v314_v28  ;;  %v528_v28 = vsel %vm527_vm7, 1, %v2304_v1 }
 0x145   :  { %v2030_v30 = vpop.eup %2029 }
 0x1a9   :  { %v325_v31 = vpop.permute.xlu0 %324 }
 0x1aa   :  { %v327_v32 = vmul.f32 %v2030_v30, %v325_v31 }
 0x1ac   :  { %329 = vrot.lane.b32.xlu1 %v327_v32, %s2306_s6 }
 0x1ad   :  { %v320_v34 = vpop.permute.xlu0 %319 }
 0x1ae   :  { %v322_v35 = vmul.f32 %v2030_v30, %v320_v34 }
 0x1b0   :  { %342 = vperm.xlu1 %2012, %v340_v33  }
 0x1b4   :  { %356 = vrot.lane.b32.xlu1 %v250_v7, %s2307_s19 }
 0x21e   :  { %v330_v36 = vpop.permute.xlu1 %329 }
 0x21f   :  { %v332_v37 = vadd.f32 %v330_v36, %v322_v35 }
 0x221   :  { %2031 = vtanh.f32 %v332_v37 }
 0x22b   :  { %v2032_v38 = vpop.eup %2031 }
 0x22c   :  { %335 = vrot.lane.b32.xlu0 %v2032_v38, %s2299_s3 }
 0x22f   :  { %v2484_v39 = vpop.permute.xlu1 %342 }
 0x230   :  { %vm344_vm4 = vcmp.eq.s32.totalorder %v2484_v39, 1 }
 0x231   :  { %v360_v60 = vsel %vm344_vm4, %v332_v37, %v320_v34 }
 0x233   :  { %v357_v41 = vpop.permute.xlu1 %356 }
 0x29e   :  { %v336_v40 = vpop.permute.xlu0 %335 }
 0x29f   :  { %v2486_v42 = vmul.f32 %v2030_v30, %v336_v40 }
 0x2a1   :  { %v359_v43 = vsel %vm344_vm4, %v2486_v42, %v357_v41 }
 0x2a2   :  { %v363_v44 = vpack.c.bf16 %v359_v43, %v359_v43 }
 0x2a4   :  { %365 = vrot.lane.b32.xlu0 %v363_v44, %s2306_s6 }
 0x316   :  { %v366_v45 = vpop.permute.xlu0 %365 }
 0x317   :  { %1882 = vmatmul.mubr.msk.bf16.vlgmr.msra.gmra.mrb[4].mxu1 %vm266_vm2, %v366_v45 }
 0x318   :  { %1886 = vmatpush3.bf16.msra.mxu1 %v2431_v3  ;;  %1889 = vmatprep.mubr.msk.bf16.mxu1 %vm2305_vm0, %v2303_v0 }
 0x319   :  { %1887 = vmatprep.subr.bf16.mxu1 %v2303_v0 }
 0x31c   :  { %1888 = vmatpush3.bf16.msra.mxu1 %v2438_v6 }
 0x31d   :  { %1893 = vmatprep.subr.bf16.mxu1 %v2303_v0 }
 0x3ea   :  { %v404_v47 = vpop.f32.mrb[4].mxu1 }
 0x3eb   :  { %v410_v48 = vadd.f32 %v404_v47, %v200_v46  ;;  %v1883_v49 = vpop.f32.mrb[5].mxu1 }
 0x3ec   :  { %v407_v50 = vpop.f32.mrb[6].mxu1  ;;  %v210_v49 = vadd.f32 %v209_v17, %v2465_v13 }
 0x3ed   :  { %2033 = vtanh.f32 %v410_v48  ;;  %v1884_v51 = vpop.f32.mrb[7].mxu1  ;;  %v1759_v54 = vmul.f32 -1.442695, %v410_v48 }
 0x3ef   :  { %2035 = vpow2.f32 %v1759_v54 }
 0x3f7   :  { %v2034_v52 = vpop.eup %2033 }
 0x3f8   :  { %420 = vrot.lane.b32.xlu1 %v2034_v52, %s2299_s3 }
 0x3f9   :  { %v2036_v55 = vpop.eup %2035 }
 0x3fa   :  { %v414_v56 = vadd.f32 1.0, %v2036_v55 }
 0x3fc   :  { %438 = vperm.xlu1 %2012, %v436_v53   ;;  %2037 = vrcp.f32 %v414_v56  ;;  %v620_v56 = vsel %vm619_vm9, 1, %v2304_v1 }
 0x406   :  { %v2038_v57 = vpop.eup %2037 }
 0x407   :  { %v418_v61 = vmul.f32 %v2038_v57, %v360_v60 }
 0x46a   :  { %v421_v58 = vpop.permute.xlu1 %420 }
 0x46b   :  { %v423_v59 = vmul.f32 %v2038_v57, %v421_v58 }
 0x46d   :  { %425 = vrot.lane.b32.xlu0 %v423_v59, %s2306_s6 }
 0x47b   :  { %v2510_v5 = vpop.permute.xlu1 %438 }
 0x47c   :  { %vm440_vm6 = vcmp.eq.s32.totalorder %v2510_v5, 1 }
 0x4df   :  { %v426_v62 = vpop.permute.xlu0 %425 }
 0x4e0   :  { %v428_v63 = vadd.f32 %v426_v62, %v418_v61 }
 0x4e2   :  { %2039 = vtanh.f32 %v428_v63  ;;  %v452_v36 = vsel %vm440_vm6, %v428_v63, %v360_v60 }
 0x4ec   :  { %v2040_v4 = vpop.eup %2039 }
 0x4ed   :  { %431 = vrot.lane.b32.xlu0 %v2040_v4, %s2299_s3 }
 0x55f   :  { %v432_v7 = vpop.permute.xlu0 %431 }
 0x560   :  { %v2512_v8 = vmul.f32 %v2038_v57, %v432_v7 }
 0x562   :  { %v451_v9 = vsel %vm440_vm6, %v2512_v8, %v359_v43 }
 0x563   :  { %v455_v11 = vpack.c.bf16 %v451_v9, %v451_v9 }
 0x565   :  { %457 = vrot.lane.b32.xlu1 %v455_v11, %s2306_s6  ;;  %v2022_v11 = vld [vmem:[#allocation4 + $0x18] sm:$0xff]  }
 0x5d7   :  { %v458_v20 = vpop.permute.xlu1 %457 }
 0x5d8   :  { %1890 = vmatmul.mubr.msk.bf16.vlgmr.msra.gmra.mrb[8].mxu1 %vm266_vm2, %v458_v20 }
 0x5d9   :  { %1894 = vmatpush3.bf16.msra.mxu1 %v2431_v3  ;;  %1897 = vmatprep.mubr.msk.bf16.mxu1 %vm2305_vm0, %v2303_v0 }
 0x5da   :  { %1895 = vmatprep.subr.bf16.mxu1 %v2303_v0 }
 0x5dd   :  { %1896 = vmatpush3.bf16.msra.mxu1 %v2438_v6 }
 0x5de   :  { %1909 = vmatprep.subr.bf16.mxu1 %v2303_v0 }
 0x6ab   :  { %v496_v22 = vpop.f32.mrb[8].mxu1 }
 0x6ac   :  { %v502_v23 = vadd.f32 %v496_v22, %v206_v21  ;;  %v1891_v24 = vpop.f32.mrb[9].mxu1 }
 0x6ad   :  { %v499_v25 = vpop.f32.mrb[10].mxu1 }
 0x6ae   :  { %2041 = vtanh.f32 %v502_v23  ;;  %v1892_v26 = vpop.f32.mrb[11].mxu1  ;;  %v1762_v30 = vmul.f32 -1.442695, %v502_v23 }
 0x6b0   :  { %2043 = vpow2.f32 %v1762_v30 }
 0x6b8   :  { %v2042_v27 = vpop.eup %2041 }
 0x6b9   :  { %512 = vrot.lane.b32.xlu0 %v2042_v27, %s2299_s3 }
 0x6ba   :  { %v2044_v31 = vpop.eup %2043 }
 0x6bb   :  { %v506_v32 = vadd.f32 1.0, %v2044_v31 }
 0x6bd   :  { %530 = vperm.xlu0 %2013, %v528_v28   ;;  %2045 = vrcp.f32 %v506_v32 }
 0x6c7   :  { %v2046_v33 = vpop.eup %2045 }
 0x6c8   :  { %v510_v37 = vmul.f32 %v2046_v33, %v452_v36 }
 0x72b   :  { %v513_v34 = vpop.permute.xlu0 %512 }
 0x72c   :  { %v515_v35 = vmul.f32 %v2046_v33, %v513_v34 }
 0x72e   :  { %517 = vrot.lane.b32.xlu1 %v515_v35, %s2306_s6 }
 0x73c   :  { %v2538_v43 = vpop.permute.xlu0 %530 }
 0x73d   :  { %vm532_vm8 = vcmp.eq.s32.totalorder %v2538_v43, 1 }
 0x7a0   :  { %v518_v38 = vpop.permute.xlu1 %517 }
 0x7a1   :  { %v520_v40 = vadd.f32 %v518_v38, %v510_v37 }
 0x7a3   :  { %2047 = vtanh.f32 %v520_v40  ;;  %v544_v63 = vsel %vm532_vm8, %v520_v40, %v452_v36 }
 0x7ad   :  { %v2048_v41 = vpop.eup %2047 }
 0x7ae   :  { %523 = vrot.lane.b32.xlu1 %v2048_v41, %s2299_s3 }
 0x820   :  { %v524_v44 = vpop.permute.xlu1 %523 }
 0x821   :  { %v2540_v45 = vmul.f32 %v2046_v33, %v524_v44  ;;  %v712_v44 = vsel %vm711_vm11, 1, %v2304_v1 }
 0x823   :  { %v543_v46 = vsel %vm532_vm8, %v2540_v45, %v451_v9  ;;  %v2021_v9 = vld [vmem:[#allocation4 + $0x10] sm:$0xff]  }
 0x824   :  { %v547_v47 = vpack.c.bf16 %v543_v46, %v543_v46  ;;  %1751 = vmatmul.mubr.msk.bf16.gmra.mrb[8].mxu0 %vm148_vm1, %v2021_v9 }
 0x825   :  { %223 = vmatprep.mubr.bf16.mxu0 %v2304_v1 }
 0x826   :  { %549 = vrot.lane.b32.xlu1 %v547_v47, %s2306_s6 }
 0x82c   :  { %1752 = vmatmul.mubr.msk.bf16.gmra.mrb[12].mxu0 %vm148_vm1, %v2022_v11  ;;  %vm987_vm1 = vcmp.gt.s32.totalorder %v2477_v29, 7 }
 0x82d   :  { %1905 = vmatprep.mubr.msk.bf16.mxu0 %vm2305_vm0, %v2303_v0 }
 0x898   :  { %v550_v48 = vpop.permute.xlu1 %549 }
 0x899   :  { %1898 = vmatmul.mubr.msk.bf16.vlgmr.msra.gmra.mrb[12].mxu1 %vm266_vm2, %v550_v48 }
 0x89a   :  { %1910 = vmatpush3.bf16.msra.mxu1 %v2431_v3  ;;  %1913 = vmatprep.mubr.msk.bf16.mxu1 %vm2305_vm0, %v2303_v0 }
 0x89b   :  { %1911 = vmatprep.subr.bf16.mxu1 %v2303_v0 }
 0x89e   :  { %1912 = vmatpush3.bf16.msra.mxu1 %v2438_v6 }
 0x89f   :  { %1925 = vmatprep.subr.bf16.mxu1 %v2303_v0 }
 0x8f7   :  { %v215_v24 = vpop.f32.mrb[8].mxu0 }
 0x8f8   :  { %v2576_v25 = vpop.f32.mrb[9].mxu0  ;;  %v216_v34 = vadd.f32 %v215_v24, %v2465_v13 }
 0x8f9   :  { %v219_v26 = vpop.f32.mrb[10].mxu0 }
 0x8fa   :  { %v2578_v27 = vpop.f32.mrb[11].mxu0 }
 0x8ff   :  { %v2580_v28 = vpop.f32.mrb[12].mxu0 }
 0x900   :  { %v2582_v30 = vpop.f32.mrb[13].mxu0 }
 0x901   :  { %v2584_v31 = vpop.f32.mrb[14].mxu0 }
 0x902   :  { %v2586_v32 = vpop.f32.mrb[15].mxu0 }
 0x96c   :  { %v588_v50 = vpop.f32.mrb[12].mxu1 }
 0x96d   :  { %v594_v51 = vadd.f32 %v588_v50, %v210_v49  ;;  %v1899_v52 = vpop.f32.mrb[13].mxu1 }
 0x96e   :  { %v591_v53 = vpop.f32.mrb[14].mxu1 }
 0x96f   :  { %2049 = vtanh.f32 %v594_v51  ;;  %v1900_v54 = vpop.f32.mrb[15].mxu1  ;;  %v1765_v57 = vmul.f32 -1.442695, %v594_v51 }
 0x971   :  { %2051 = vpow2.f32 %v1765_v57 }
 0x979   :  { %v2050_v55 = vpop.eup %2049 }
 0x97a   :  { %604 = vrot.lane.b32.xlu0 %v2050_v55, %s2299_s3 }
 0x97b   :  { %v2052_v58 = vpop.eup %2051 }
 0x97c   :  { %v598_v59 = vadd.f32 1.0, %v2052_v58 }
 0x97e   :  { %622 = vperm.xlu0 %2013, %v620_v56   ;;  %2053 = vrcp.f32 %v598_v59 }
 0x988   :  { %v2054_v60 = vpop.eup %2053 }
 0x989   :  { %v602_v2 = vmul.f32 %v2054_v60, %v544_v63 }
 0x9ec   :  { %v605_v61 = vpop.permute.xlu0 %604 }
 0x9ed   :  { %v607_v62 = vmul.f32 %v2054_v60, %v605_v61 }
 0x9ef   :  { %609 = vrot.lane.b32.xlu1 %v607_v62, %s2306_s6 }
 0x9fd   :  { %v2567_v17 = vpop.permute.xlu0 %622 }
 0x9fe   :  { %vm624_vm10 = vcmp.eq.s32.totalorder %v2567_v17, 1 }
 0xa61   :  { %v610_v4 = vpop.permute.xlu1 %609 }
 0xa62   :  { %v612_v7 = vadd.f32 %v610_v4, %v602_v2 }
 0xa64   :  { %2055 = vtanh.f32 %v612_v7  ;;  %v636_v52 = vsel %vm624_vm10, %v612_v7, %v544_v63  ;;  %v220_v63 = vadd.f32 %v219_v26, %v2465_v13 }
 0xa6e   :  { %v2056_v14 = vpop.eup %2055 }
 0xa6f   :  { %615 = vrot.lane.b32.xlu1 %v2056_v14, %s2299_s3  ;;  %v804_v14 = vsel %vm803_vm13, 1, %v2304_v1 }
 0xae1   :  { %v616_v20 = vpop.permute.xlu1 %615 }
 0xae2   :  { %v2569_v21 = vmul.f32 %v2054_v60, %v616_v20 }
 0xae4   :  { %v635_v22 = vsel %vm624_vm10, %v2569_v21, %v543_v46 }
 0xae5   :  { %v639_v23 = vpack.c.bf16 %v635_v22, %v635_v22 }
 0xae7   :  { %641 = vrot.lane.b32.xlu0 %v639_v23, %s2306_s6 }
 0xb59   :  { %v642_v33 = vpop.permute.xlu0 %641 }
 0xb5a   :  { %1906 = vmatmul.mubr.msk.bf16.vlgmr.msra.gmra.mrb[16].mxu0 %vm266_vm2, %v642_v33 }
 0xb5b   :  { %1918 = vmatpush3.bf16.msra.mxu0 %v2431_v3  ;;  %1921 = vmatprep.mubr.msk.bf16.mxu0 %vm2305_vm0, %v2303_v0 }
 0xb5c   :  { %1919 = vmatprep.subr.bf16.mxu0 %v2303_v0 }
 0xb5f   :  { %1920 = vmatpush3.bf16.msra.mxu0 %v2438_v6 }
 0xb60   :  { %1933 = vmatprep.subr.bf16.mxu0 %v2303_v0 }
 0xc2d   :  { %v680_v35 = vpop.f32.mrb[16].mxu0 }
 0xc2e   :  { %v686_v36 = vadd.f32 %v680_v35, %v216_v34  ;;  %v1907_v37 = vpop.f32.mrb[17].mxu0 }
 0xc2f   :  { %v683_v38 = vpop.f32.mrb[18].mxu0 }
 0xc30   :  { %2057 = vtanh.f32 %v686_v36  ;;  %v1908_v40 = vpop.f32.mrb[19].mxu0  ;;  %v1768_v46 = vmul.f32 -1.442695, %v686_v36 }
 0xc32   :  { %2059 = vpow2.f32 %v1768_v46 }
 0xc3a   :  { %v2058_v41 = vpop.eup %2057 }
 0xc3b   :  { %696 = vrot.lane.b32.xlu1 %v2058_v41, %s2299_s3 }
 0xc3c   :  { %v2060_v47 = vpop.eup %2059 }
 0xc3d   :  { %v690_v48 = vadd.f32 1.0, %v2060_v47  ;;  %v2646_v47 = vld [vmem:[#allocation10 + $0x10] sm:$0xff]  }
 0xc3f   :  { %714 = vperm.xlu1 %2012, %v712_v44   ;;  %2061 = vrcp.f32 %v690_v48 }
 0xc49   :  { %v2062_v49 = vpop.eup %2061 }
 0xc4a   :  { %v694_v53 = vmul.f32 %v2062_v49, %v636_v52 }
 0xcad   :  { %v697_v50 = vpop.permute.xlu1 %696 }
 0xcae   :  { %v699_v51 = vmul.f32 %v2062_v49, %v697_v50  ;;  %v1004_v50 = vld [vmem:[#allocation7 + $0x8] sm:$0xff] }
 0xcb0   :  { %701 = vrot.lane.b32.xlu0 %v699_v51, %s2306_s6  ;;  %v1009_v51 = vpack.c.bf16 %v1004_v50, %v1004_v50 }
 0xcbe   :  { %v2603_v57 = vpop.permute.xlu1 %714 }
 0xcbf   :  { %vm716_vm12 = vcmp.eq.s32.totalorder %v2603_v57, 1 }
 0xd22   :  { %v702_v54 = vpop.permute.xlu0 %701 }
 0xd23   :  { %v704_v55 = vadd.f32 %v702_v54, %v694_v53  ;;  %v114_v54 = vsub.s32 1, %v2456_v10 }
 0xd25   :  { %2063 = vtanh.f32 %v704_v55  ;;  %v2626_v33 = vsel %vm716_vm12, %v704_v55, %v636_v52  ;;  %v226_v52 = vadd.f32 %v2580_v28, %v2465_v13 }
 0xd2f   :  { %v2064_v56 = vpop.eup %2063 }
 0xd30   :  { %707 = vrot.lane.b32.xlu0 %v2064_v56, %s2299_s3 }
 0xda2   :  { %v708_v58 = vpop.permute.xlu0 %707 }
 0xda3   :  { %v2605_v59 = vmul.f32 %v2062_v49, %v708_v58  ;;  %v2650_v49 = vld [vmem:[#allocation10 + $0x18] sm:$0xff]  }
 0xda5   :  { %v727_v60 = vsel %vm716_vm12, %v2605_v59, %v635_v22 }
 0xda6   :  { %v731_v61 = vpack.c.bf16 %v727_v60, %v727_v60 }
 0xda8   :  { %733 = vrot.lane.b32.xlu1 %v731_v61, %s2306_s6  ;;  %v2668_v61 = vrot.slane %v2462_v12, %v114_v54  ;;  %v896_v12 = vsel %vm895_vm15, 1, %v2304_v1 }
 0xe1a   :  { %v734_v62 = vpop.permute.xlu1 %733 }
 0xe1b   :  { %1914 = vmatmul.mubr.msk.bf16.vlgmr.msra.gmra.mrb[16].mxu1 %vm266_vm2, %v734_v62  ;;  %v232_v62 = vadd.f32 %v2586_v32, %v2668_v61  ;;  %v988_v32 = vsel %vm987_vm1, 1, %v2304_v1 }
 0xe1c   :  { %1926 = vmatpush3.bf16.msra.mxu1 %v2431_v3  ;;  %1929 = vmatprep.mubr.msk.bf16.mxu1 %vm2305_vm0, %v2303_v0 }
 0xe1d   :  { %1927 = vmatprep.subr.bf16.mxu1 %v2303_v0 }
 0xe20   :  { %1928 = vmatpush3.bf16.msra.mxu1 %v2438_v6 }
 0xe21   :  { %1941 = vmatprep.subr.bf16.mxu1 %v2303_v0 }
 0xeee   :  { %v772_v2 = vpop.f32.mrb[16].mxu1 }
 0xeef   :  { %v778_v4 = vadd.f32 %v772_v2, %v220_v63  ;;  %v1915_v7 = vpop.f32.mrb[17].mxu1 }
 0xef0   :  { %v775_v9 = vpop.f32.mrb[18].mxu1 }
 0xef1   :  { %2065 = vtanh.f32 %v778_v4  ;;  %v1916_v11 = vpop.f32.mrb[19].mxu1  ;;  %v1771_v20 = vmul.f32 -1.442695, %v778_v4 }
 0xef2   :  { %v1006_v11 = vld [vmem:[#allocation9 + $0x8] sm:$0xff] }
 0xef3   :  { %2067 = vpow2.f32 %v1771_v20 }
 0xefb   :  { %v2066_v3 = vpop.eup %2065 }
 0xefc   :  { %788 = vrot.lane.b32.xlu0 %v2066_v3, %s2299_s3 }
 0xefd   :  { %v2068_v6 = vpop.eup %2067 }
 0xefe   :  { %v782_v22 = vadd.f32 1.0, %v2068_v6 }
 0xf00   :  { %806 = vperm.xlu0 %2013, %v804_v14   ;;  %2069 = vrcp.f32 %v782_v22 }
 0xf0a   :  { %v2070_v23 = vpop.eup %2069 }
 0xf0b   :  { %v786_v34 = vmul.f32 %v2070_v23, %v2626_v33 }
 0xf6e   :  { %v789_v24 = vpop.permute.xlu0 %788 }
 0xf6f   :  { %v791_v26 = vmul.f32 %v2070_v23, %v789_v24 }
 0xf71   :  { %793 = vrot.lane.b32.xlu1 %v791_v26, %s2306_s6 }
 0xf7f   :  { %v2633_v38 = vpop.permute.xlu0 %806 }
 0xf80   :  { %vm808_vm14 = vcmp.eq.s32.totalorder %v2633_v38, 1 }
 0xfe3   :  { %v794_v35 = vpop.permute.xlu1 %793 }
 0xfe4   :  { %v2629_v36 = vadd.f32 %v794_v35, %v786_v34 }
 0xfe6   :  { %2071 = vtanh.f32 %v2629_v36 }
 0xff0   :  { %v2072_v37 = vpop.eup %2071 }
 0xff1   :  { %799 = vrot.lane.b32.xlu1 %v2072_v37, %s2299_s3  ;;  %v2686_v37 = vsel %vm808_vm14, %v2629_v36, %v2626_v33 }
0x1063   :  { %v800_v40 = vpop.permute.xlu1 %799 }
0x1064   :  { %v2635_v41 = vmul.f32 %v2070_v23, %v800_v40 }
0x1066   :  { %v2641_v44 = vsel %vm808_vm14, %v2635_v41, %v727_v60 }
0x1067   :  { %v823_v46 = vpack.c.bf16 %v2641_v44, %v2641_v44 }
0x1069   :  { %825 = vrot.lane.b32.xlu0 %v823_v46, %s2306_s6 }
0x10db   :  { %v826_v48 = vpop.permute.xlu0 %825 }
0x10dc   :  { %1922 = vmatmul.mubr.msk.bf16.vlgmr.msra.gmra.mrb[20].mxu0 %vm266_vm2, %v826_v48 }
0x10dd   :  { %1934 = vmatpush3.bf16.msra.mxu0 %v2646_v47  ;;  %1937 = vmatprep.mubr.msk.bf16.mxu0 %vm2305_vm0, %v2303_v0 }
0x10de   :  { %1935 = vmatprep.subr.bf16.mxu0 %v2303_v0 }
0x10e1   :  { %1936 = vmatpush3.bf16.msra.mxu0 %v2650_v49 }
0x10e2   :  { %1949 = vmatprep.subr.bf16.mxu0 %v2303_v0 }
0x10e4   :  { %1938 = vmatmul.mubr.msk.bf16.vlgmr.msra.gmra.mrb[24].mxu0 %vm266_vm2, %v1009_v51 }
0x10e5   :  { %1950 = vmatpush3.bf16.msra.mxu0 %v2646_v47  ;;  %1953 = vmatprep.mubr.msk.bf16.mxu0 %vm2305_vm0, %v2303_v0 }
0x10e6   :  { %1951 = vmatprep.subr.bf16.mxu0 %v2303_v0 }
0x10e9   :  { %1952 = vmatpush3.bf16.msra.mxu0 %v2650_v49 }
0x10ea   :  { %1965 = vmatprep.subr.bf16.mxu0 %v2303_v0 }
0x11af   :  { %v864_v53 = vpop.f32.mrb[20].mxu0 }
0x11b0   :  { %v870_v55 = vadd.f32 %v864_v53, %v226_v52  ;;  %v1923_v56 = vpop.f32.mrb[21].mxu0 }
0x11b1   :  { %v867_v58 = vpop.f32.mrb[22].mxu0 }
0x11b2   :  { %2073 = vtanh.f32 %v870_v55  ;;  %v1924_v60 = vpop.f32.mrb[23].mxu0  ;;  %v1774_v3 = vmul.f32 -1.442695, %v870_v55 }
0x11b7   :  { %v1059_v63 = vpop.f32.mrb[24].mxu0 }
0x11b8   :  { %v1065_v2 = vadd.f32 %v1059_v63, %v232_v62  ;;  %v1939_v4 = vpop.f32.mrb[25].mxu0 }
0x11b9   :  { %v1062_v7 = vpop.f32.mrb[26].mxu0 }
0x11ba   :  { %2075 = vtanh.f32 %v1065_v2  ;;  %v1940_v28 = vpop.f32.mrb[27].mxu0  ;;  %v1782_v14 = vmul.f32 -1.442695, %v1065_v2 }
0x11bb   :  { %2077 = vpow2.f32 %v1774_v3 }
0x11bc   :  { %v2074_v9 = vpop.eup %2073  ;;  %2079 = vpow2.f32 %v1782_v14 }
0x11bd   :  { %880 = vrot.lane.b32.xlu1 %v2074_v9, %s2299_s3 }
0x11c4   :  { %v2076_v10 = vpop.eup %2075 }
0x11c5   :  { %1079 = vrot.lane.b32.xlu0 %v2076_v10, %s2299_s3  ;;  %v2078_v20 = vpop.eup %2077  ;;  %v230_v10 = vadd.f32 %v2584_v31, %v2465_v13 }
0x11c6   :  { %v874_v6 = vadd.f32 1.0, %v2078_v20  ;;  %v2080_v22 = vpop.eup %2079  ;;  %v228_v20 = vadd.f32 %v2582_v30, %v2668_v61 }
0x11c7   :  { %v1069_v23 = vadd.f32 1.0, %v2080_v22 }
0x11c8   :  { %2081 = vrcp.f32 %v874_v6 }
0x11c9   :  { %1074 = vrot.lane.b32.xlu0 %v1006_v11, %s2306_s6  ;;  %2083 = vrcp.f32 %v1069_v23 }
0x11cd   :  { %898 = vperm.xlu0 %2013, %v896_v12  }
0x11d1   :  { %990 = vperm.xlu0 %2013, %v988_v32  }
0x11d2   :  { %v2082_v24 = vpop.eup %2081 }
0x11d3   :  { %v2084_v29 = vpop.eup %2083  ;;  %v878_v40 = vmul.f32 %v2082_v24, %v2686_v37 }
0x11d5   :  { %1105 = vrot.lane.b32.xlu0 %v1004_v50, %s2307_s19 }
0x122f   :  { %v881_v26 = vpop.permute.xlu1 %880 }
0x1230   :  { %v883_v34 = vmul.f32 %v2082_v24, %v881_v26 }
0x1232   :  { %885 = vrot.lane.b32.xlu1 %v883_v34, %s2306_s6 }
0x1237   :  { %v1080_v1 = vpop.permute.xlu0 %1079 }
0x1238   :  { %v1082_v35 = vmul.f32 %v2084_v29, %v1080_v1 }
0x123a   :  { %1084 = vrot.lane.b32.xlu1 %v1082_v35, %s2306_s6 }
0x123b   :  { %v2692_v50 = vpop.permute.xlu0 %1074 }
0x123c   :  { %v1077_v51 = vmul.f32 %v2084_v29, %v2692_v50 }
0x124c   :  { %v2697_v33 = vpop.permute.xlu0 %898 }
0x124d   :  { %vm900_vm3 = vcmp.eq.s32.totalorder %v2697_v33, 1 }
0x1250   :  { %v2706_v60 = vpop.permute.xlu0 %990 }
0x1251   :  { %vm992_vm5 = vcmp.eq.s32.totalorder %v2706_v60, 1 }
0x1254   :  { %v1106_v2 = vpop.permute.xlu0 %1105 }
0x12a4   :  { %v886_v46 = vpop.permute.xlu1 %885 }
0x12a5   :  { %v2689_v48 = vadd.f32 %v886_v46, %v878_v40 }
0x12a7   :  { %2085 = vtanh.f32 %v2689_v48 }
0x12ac   :  { %v1085_v52 = vpop.permute.xlu1 %1084 }
0x12ad   :  { %v1087_v53 = vadd.f32 %v1085_v52, %v1077_v51 }
0x12af   :  { %2087 = vtanh.f32 %v1087_v53  ;;  %v1109_v30 = vsel %vm992_vm5, %v1087_v53, %v2692_v50  ;;  %v222_v50 = vadd.f32 %v2578_v27, %v2668_v61 }
0x12b1   :  { %v2086_v54 = vpop.eup %2085 }
0x12b2   :  { %891 = vrot.lane.b32.xlu1 %v2086_v54, %s2299_s3 }
0x12b9   :  { %v2088_v55 = vpop.eup %2087 }
0x12ba   :  { %1090 = vrot.lane.b32.xlu1 %v2088_v55, %s2299_s3 }
0x1324   :  { %v892_v36 = vpop.permute.xlu1 %891 }
0x1325   :  { %v2699_v56 = vmul.f32 %v2082_v24, %v892_v36 }
0x1327   :  { %v911_v58 = vsel %vm900_vm3, %v2699_v56, %v2641_v44 }
0x1328   :  { %v915_v62 = vpack.c.bf16 %v911_v58, %v911_v58 }
0x132a   :  { %917 = vrot.lane.b32.xlu1 %v915_v62, %s2306_s6 }
0x132c   :  { %v1091_v63 = vpop.permute.xlu1 %1090 }
0x132d   :  { %v2709_v4 = vmul.f32 %v2084_v29, %v1091_v63 }
0x132f   :  { %v1108_v7 = vsel %vm992_vm5, %v2709_v4, %v1106_v2 }
0x1330   :  { %v1112_v28 = vpack.c.bf16 %v1108_v7, %v1108_v7 }
0x1332   :  { %1114 = vrot.lane.b32.xlu0 %v1112_v28, %s2306_s6 }
0x139c   :  { %v918_v9 = vpop.permute.xlu1 %917 }
0x139d   :  { %1930 = vmatmul.mubr.msk.bf16.vlgmr.msra.gmra.mrb[20].mxu1 %vm266_vm2, %v918_v9 }
0x139e   :  { %1942 = vmatpush3.bf16.msra.mxu1 %v2646_v47  ;;  %1945 = vmatprep.mubr.msk.bf16.mxu1 %vm2305_vm0, %v2303_v0 }
0x139f   :  { %1943 = vmatprep.subr.bf16.mxu1 %v2303_v0 }
0x13a2   :  { %1944 = vmatpush3.bf16.msra.mxu1 %v2650_v49 }
0x13a3   :  { %1957 = vmatprep.subr.bf16.mxu1 %v2303_v0 }
0x13a4   :  { %v1115_v44 = vpop.permute.xlu0 %1114 }
0x13a5   :  { %1946 = vmatmul.mubr.msk.bf16.vlgmr.msra.gmra.mrb[24].mxu1 %vm266_vm2, %v1115_v44 }
0x13a6   :  { %1958 = vmatpush3.bf16.msra.mxu1 %v2646_v47  ;;  %1961 = vmatprep.mubr.msk.bf16.mxu1 %vm2305_vm0, %v2303_v0 }
0x13a7   :  { %1959 = vmatprep.subr.bf16.mxu1 %v2303_v0 }
0x13aa   :  { %1960 = vmatpush3.bf16.msra.mxu1 %v2650_v49 }
0x13ab   :  { %1973 = vmatprep.subr.bf16.mxu1 %v2303_v0 }
0x1470   :  { %v956_v11 = vpop.f32.mrb[20].mxu1 }
0x1471   :  { %v2732_v12 = vadd.f32 %v956_v11, %v230_v10  ;;  %v1931_v32 = vpop.f32.mrb[21].mxu1 }
0x1472   :  { %v959_v3 = vpop.f32.mrb[22].mxu1 }
0x1473   :  { %v1932_v14 = vpop.f32.mrb[23].mxu1 }
0x1478   :  { %v1153_v6 = vpop.f32.mrb[24].mxu1 }
0x1479   :  { %v1159_v22 = vadd.f32 %v1153_v6, %v228_v20  ;;  %v1947_v23 = vpop.f32.mrb[25].mxu1 }
0x147a   :  { %v1156_v24 = vpop.f32.mrb[26].mxu1 }
0x147b   :  { %2089 = vtanh.f32 %v1159_v22  ;;  %v1948_v26 = vpop.f32.mrb[27].mxu1  ;;  %v1785_v29 = vmul.f32 -1.442695, %v1159_v22 }
0x147d   :  { %2091 = vpow2.f32 %v1785_v29 }
0x1485   :  { %v2090_v34 = vpop.eup %2089 }
0x1486   :  { %1169 = vrot.lane.b32.xlu1 %v2090_v34, %s2299_s3 }
0x1487   :  { %v2092_v13 = vpop.eup %2091 }
0x1488   :  { %v1163_v31 = vadd.f32 1.0, %v2092_v13 }
0x148a   :  { %2093 = vrcp.f32 %v1163_v31 }
0x1494   :  { %v2094_v1 = vpop.eup %2093 }
0x1495   :  { %v1167_v46 = vmul.f32 %v2094_v1, %v1109_v30 }
0x14f8   :  { %v1170_v35 = vpop.permute.xlu1 %1169 }
0x14f9   :  { %v1172_v40 = vmul.f32 %v2094_v1, %v1170_v35 }
0x14fb   :  { %1174 = vrot.lane.b32.xlu0 %v1172_v40, %s2306_s6 }
0x156d   :  { %v1175_v51 = vpop.permute.xlu0 %1174 }
0x156e   :  { %v1177_v52 = vadd.f32 %v1175_v51, %v1167_v46 }
0x1570   :  { %2095 = vtanh.f32 %v1177_v52  ;;  %v1195_v27 = vsel %vm900_vm3, %v1177_v52, %v1109_v30 }
0x157a   :  { %v2096_v54 = vpop.eup %2095 }
0x157b   :  { %1180 = vrot.lane.b32.xlu1 %v2096_v54, %s2299_s3 }
0x15ed   :  { %v1181_v55 = vpop.permute.xlu1 %1180 }
0x15ee   :  { %v2742_v36 = vmul.f32 %v2094_v1, %v1181_v55  ;;  %v218_v1 = vadd.f32 %v2576_v25, %v2668_v61 }
0x15f0   :  { %v1194_v58 = vsel %vm900_vm3, %v2742_v36, %v1108_v7  ;;  %v1184_v17 = vsel %vm900_vm3, %v2742_v36, 0.0 }
0x15f1   :  { %v1198_v62 = vpack.c.bf16 %v1194_v58, %v1194_v58 }
0x15f3   :  { %1200 = vrot.lane.b32.xlu0 %v1198_v62, %s2306_s6 }
0x1665   :  { %v1201_v63 = vpop.permute.xlu0 %1200 }
0x1666   :  { %1954 = vmatmul.mubr.msk.bf16.vlgmr.msra.gmra.mrb[28].mxu0 %vm266_vm2, %v1201_v63 }
0x1667   :  { %1966 = vmatpush3.bf16.msra.mxu0 %v2646_v47  ;;  %1969 = vmatprep.mubr.msk.bf16.mxu0 %vm2305_vm0, %v2303_v0 }
0x1668   :  { %1967 = vmatprep.subr.bf16.mxu0 %v2303_v0 }
0x166b   :  { %1968 = vmatpush3.bf16.msra.mxu0 %v2650_v49 }
0x166c   :  { %1981 = vmatprep.subr.bf16.mxu0 %v2303_v0 }
0x1739   :  { %v1239_v53 = vpop.f32.mrb[28].mxu0 }
0x173a   :  { %v1245_v2 = vadd.f32 %v1239_v53, %v222_v50  ;;  %v1955_v7 = vpop.f32.mrb[29].mxu0 }
0x173b   :  { %v1242_v28 = vpop.f32.mrb[30].mxu0 }
0x173c   :  { %2097 = vtanh.f32 %v1245_v2  ;;  %v1956_v9 = vpop.f32.mrb[31].mxu0  ;;  %v1788_v10 = vmul.f32 -1.442695, %v1245_v2 }
0x173e   :  { %2099 = vpow2.f32 %v1788_v10 }
0x1746   :  { %v2098_v44 = vpop.eup %2097 }
0x1747   :  { %1255 = vrot.lane.b32.xlu1 %v2098_v44, %s2299_s3 }
0x1748   :  { %v2100_v11 = vpop.eup %2099 }
0x1749   :  { %v1249_v32 = vadd.f32 1.0, %v2100_v11 }
0x174b   :  { %2101 = vrcp.f32 %v1249_v32 }
0x1755   :  { %v2102_v3 = vpop.eup %2101 }
0x1756   :  { %v1253_v6 = vmul.f32 %v2102_v3, %v1195_v27 }
0x17b9   :  { %v1256_v14 = vpop.permute.xlu1 %1255 }
0x17ba   :  { %v1258_v20 = vmul.f32 %v2102_v3, %v1256_v14 }
0x17bc   :  { %1260 = vrot.lane.b32.xlu0 %v1258_v20, %s2306_s6 }
0x182e   :  { %v1261_v22 = vpop.permute.xlu0 %1260 }
0x182f   :  { %v1263_v23 = vadd.f32 %v1261_v22, %v1253_v6 }
0x1831   :  { %2103 = vtanh.f32 %v1263_v23  ;;  %v1281_v25 = vsel %vm808_vm14, %v1263_v23, %v1195_v27 }
0x183b   :  { %v2104_v24 = vpop.eup %2103 }
0x183c   :  { %1266 = vrot.lane.b32.xlu1 %v2104_v24, %s2299_s3 }
0x18ae   :  { %v1267_v26 = vpop.permute.xlu1 %1266 }
0x18af   :  { %v2762_v34 = vmul.f32 %v2102_v3, %v1267_v26  ;;  %v212_v3 = vadd.f32 %v2521_v19, %v2668_v61 }
0x18b1   :  { %v1280_v29 = vsel %vm808_vm14, %v2762_v34, %v1194_v58 }
0x18b2   :  { %v1284_v13 = vpack.c.bf16 %v1280_v29, %v1280_v29 }
0x18b4   :  { %1286 = vrot.lane.b32.xlu0 %v1284_v13, %s2306_s6 }
0x1926   :  { %v1287_v31 = vpop.permute.xlu0 %1286 }
0x1927   :  { %1962 = vmatmul.mubr.msk.bf16.vlgmr.msra.gmra.mrb[28].mxu1 %vm266_vm2, %v1287_v31 }
0x1928   :  { %1974 = vmatpush3.bf16.msra.mxu1 %v2646_v47  ;;  %1977 = vmatprep.mubr.msk.bf16.mxu1 %vm2305_vm0, %v2303_v0 }
0x1929   :  { %1975 = vmatprep.subr.bf16.mxu1 %v2303_v0 }
0x192c   :  { %1976 = vmatpush3.bf16.msra.mxu1 %v2650_v49 }
0x192d   :  { %1989 = vmatprep.subr.bf16.mxu1 %v2303_v0 }
0x19fa   :  { %v1325_v35 = vpop.f32.mrb[28].mxu1 }
0x19fb   :  { %v1331_v40 = vadd.f32 %v1325_v35, %v218_v1  ;;  %v1963_v30 = vpop.f32.mrb[29].mxu1 }
0x19fc   :  { %v1328_v46 = vpop.f32.mrb[30].mxu1 }
0x19fd   :  { %2105 = vtanh.f32 %v1331_v40  ;;  %v1964_v51 = vpop.f32.mrb[31].mxu1  ;;  %v1791_v54 = vmul.f32 -1.442695, %v1331_v40 }
0x19ff   :  { %2107 = vpow2.f32 %v1791_v54 }
0x1a07   :  { %v2106_v52 = vpop.eup %2105 }
0x1a08   :  { %1341 = vrot.lane.b32.xlu1 %v2106_v52, %s2299_s3 }
0x1a09   :  { %v2108_v55 = vpop.eup %2107 }
0x1a0a   :  { %v1335_v58 = vadd.f32 1.0, %v2108_v55 }
0x1a0c   :  { %2109 = vrcp.f32 %v1335_v58 }
0x1a16   :  { %v2110_v62 = vpop.eup %2109 }
0x1a17   :  { %v1339_v53 = vmul.f32 %v2110_v62, %v1281_v25 }
0x1a7a   :  { %v1342_v63 = vpop.permute.xlu1 %1341 }
0x1a7b   :  { %v1344_v50 = vmul.f32 %v2110_v62, %v1342_v63 }
0x1a7d   :  { %1346 = vrot.lane.b32.xlu0 %v1344_v50, %s2306_s6 }
0x1aef   :  { %v1347_v2 = vpop.permute.xlu0 %1346 }
0x1af0   :  { %v1349_v7 = vadd.f32 %v1347_v2, %v1339_v53 }
0x1af2   :  { %2111 = vtanh.f32 %v1349_v7  ;;  %v1367_v19 = vsel %vm716_vm12, %v1349_v7, %v1281_v25 }
0x1afc   :  { %v2112_v28 = vpop.eup %2111 }
0x1afd   :  { %1352 = vrot.lane.b32.xlu1 %v2112_v28, %s2299_s3 }
0x1b6f   :  { %v1353_v9 = vpop.permute.xlu1 %1352 }
0x1b70   :  { %v2782_v44 = vmul.f32 %v2110_v62, %v1353_v9  ;;  %v208_v62 = vadd.f32 %v2519_v15, %v2668_v61 }
0x1b72   :  { %v1366_v10 = vsel %vm716_vm12, %v2782_v44, %v1280_v29  ;;  %v1356_v38 = vsel %vm716_vm12, %v2782_v44, 0.0 }
0x1b73   :  { %v1370_v11 = vpack.c.bf16 %v1366_v10, %v1366_v10 }
0x1b75   :  { %1372 = vrot.lane.b32.xlu0 %v1370_v11, %s2306_s6 }
0x1be7   :  { %v1373_v32 = vpop.permute.xlu0 %1372 }
0x1be8   :  { %1970 = vmatmul.mubr.msk.bf16.vlgmr.msra.gmra.mrb[32].mxu0 %vm266_vm2, %v1373_v32 }
0x1be9   :  { %1982 = vmatpush3.bf16.msra.mxu0 %v2646_v47  ;;  %1985 = vmatprep.mubr.msk.bf16.mxu0 %vm2305_vm0, %v2303_v0 }
0x1bea   :  { %1983 = vmatprep.subr.bf16.mxu0 %v2303_v0 }
0x1bed   :  { %1984 = vmatpush3.bf16.msra.mxu0 %v2650_v49 }
0x1cbb   :  { %v1411_v14 = vpop.f32.mrb[32].mxu0 }
0x1cbc   :  { %v1417_v20 = vadd.f32 %v1411_v14, %v212_v3  ;;  %v1971_v27 = vpop.f32.mrb[33].mxu0 }
0x1cbd   :  { %v1414_v6 = vpop.f32.mrb[34].mxu0 }
0x1cbe   :  { %2113 = vtanh.f32 %v1417_v20  ;;  %v1972_v22 = vpop.f32.mrb[35].mxu0  ;;  %v1794_v24 = vmul.f32 -1.442695, %v1417_v20 }
0x1cc0   :  { %2115 = vpow2.f32 %v1794_v24  ;;  %v202_v24 = vadd.f32 %v2470_v18, %v2668_v61 }
0x1cc8   :  { %v2114_v23 = vpop.eup %2113 }
0x1cc9   :  { %1427 = vrot.lane.b32.xlu1 %v2114_v23, %s2299_s3 }
0x1cca   :  { %v2116_v26 = vpop.eup %2115 }
0x1ccb   :  { %v1421_v29 = vadd.f32 1.0, %v2116_v26 }
0x1ccd   :  { %2117 = vrcp.f32 %v1421_v29 }
0x1cd7   :  { %v2118_v13 = vpop.eup %2117 }
0x1cd8   :  { %v1425_v35 = vmul.f32 %v2118_v13, %v1367_v19 }
0x1d3b   :  { %v1428_v31 = vpop.permute.xlu1 %1427 }
0x1d3c   :  { %v1430_v1 = vmul.f32 %v2118_v13, %v1428_v31 }
0x1d3e   :  { %1432 = vrot.lane.b32.xlu0 %v1430_v1, %s2306_s6 }
0x1db0   :  { %v1433_v40 = vpop.permute.xlu0 %1432 }
0x1db1   :  { %v1435_v30 = vadd.f32 %v1433_v40, %v1425_v35 }
0x1db3   :  { %2119 = vtanh.f32 %v1435_v30  ;;  %v1453_v15 = vsel %vm624_vm10, %v1435_v30, %v1367_v19 }
0x1dbd   :  { %v2120_v46 = vpop.eup %2119 }
0x1dbe   :  { %1438 = vrot.lane.b32.xlu1 %v2120_v46, %s2299_s3 }
0x1e30   :  { %v1439_v51 = vpop.permute.xlu1 %1438 }
0x1e31   :  { %v2801_v52 = vmul.f32 %v2118_v13, %v1439_v51 }
0x1e33   :  { %v1452_v54 = vsel %vm624_vm10, %v2801_v52, %v1366_v10 }
0x1e34   :  { %v1456_v55 = vpack.c.bf16 %v1452_v54, %v1452_v54 }
0x1e36   :  { %1458 = vrot.lane.b32.xlu0 %v1456_v55, %s2306_s6 }
0x1ea8   :  { %v1459_v58 = vpop.permute.xlu0 %1458 }
0x1ea9   :  { %1978 = vmatmul.mubr.msk.bf16.vlgmr.msra.gmra.mrb[32].mxu1 %vm266_vm2, %v1459_v58 }
0x1eaa   :  { %1990 = vmatpush3.bf16.msra.mxu1 %v2646_v47  ;;  %1993 = vmatprep.mubr.msk.bf16.mxu1 %vm2305_vm0, %v2303_v0  ;;  %vm353_vm0 = vcmask 257024  }
0x1eab   :  { %1991 = vmatprep.subr.bf16.mxu1 %v2303_v0 }
0x1eae   :  { %1992 = vmatpush3.bf16.msra.mxu1 %v2650_v49 }
0x1f7c   :  { %v1497_v63 = vpop.f32.mrb[32].mxu1 }
0x1f7d   :  { %v1503_v50 = vadd.f32 %v1497_v63, %v208_v62  ;;  %v1979_v25 = vpop.f32.mrb[33].mxu1 }
0x1f7e   :  { %v1500_v53 = vpop.f32.mrb[34].mxu1  ;;  %v1777_v25 = vmul.f32 -1.442695, %v2732_v12 }
0x1f7f   :  { %2121 = vtanh.f32 %v1503_v50  ;;  %v1980_v2 = vpop.f32.mrb[35].mxu1  ;;  %v1797_v47 = vmul.f32 -1.442695, %v1503_v50 }
0x1f81   :  { %2123 = vpow2.f32 %v1797_v47 }
0x1f89   :  { %v2122_v7 = vpop.eup %2121 }
0x1f8a   :  { %1513 = vrot.lane.b32.xlu1 %v2122_v7, %s2299_s3 }
0x1f8b   :  { %v2124_v28 = vpop.eup %2123 }
0x1f8c   :  { %v1507_v9 = vadd.f32 1.0, %v2124_v28 }
0x1f8e   :  { %2125 = vrcp.f32 %v1507_v9 }
0x1f98   :  { %v2126_v0 = vpop.eup %2125 }
0x1f99   :  { %v1511_v11 = vmul.f32 %v2126_v0, %v1453_v15 }
0x1ffc   :  { %v1514_v10 = vpop.permute.xlu1 %1513 }
0x1ffd   :  { %v1516_v49 = vmul.f32 %v2126_v0, %v1514_v10 }
0x1fff   :  { %1518 = vrot.lane.b32.xlu0 %v1516_v49, %s2306_s6 }
0x2071   :  { %v1519_v32 = vpop.permute.xlu0 %1518 }
0x2072   :  { %v1521_v3 = vadd.f32 %v1519_v32, %v1511_v11 }
0x2074   :  { %2127 = vtanh.f32 %v1521_v3  ;;  %v2833_v18 = vsel %vm532_vm8, %v1521_v3, %v1453_v15 }
0x207e   :  { %v2128_v14 = vpop.eup %2127 }
0x207f   :  { %1524 = vrot.lane.b32.xlu1 %v2128_v14, %s2299_s3 }
0x20f1   :  { %v1525_v20 = vpop.permute.xlu1 %1524 }
0x20f2   :  { %v2820_v27 = vmul.f32 %v2126_v0, %v1525_v20  ;;  %v345_v20 = vsel %vm344_vm4, %v2486_v42, 0.0  ;;  %v901_v42 = vsel %vm900_vm3, %v2699_v56, 0.0  ;;  %v1442_v56 = vsel %vm624_vm10, %v2801_v52, 0.0 }
0x20f4   :  { %v1538_v6 = vsel %vm532_vm8, %v2820_v27, %v1452_v54  ;;  %v1528_v60 = vsel %vm532_vm8, %v2820_v27, 0.0 }
0x20f5   :  { %v1542_v22 = vpack.c.bf16 %v1538_v6, %v1538_v6 }
0x20f7   :  { %1544 = vrot.lane.b32.xlu0 %v1542_v22, %s2306_s6  ;;  %v717_v22 = vsel %vm716_vm12, %v2605_v59, 0.0  ;;  %v1270_v59 = vsel %vm808_vm14, %v2762_v34, 0.0 }
0x2169   :  { %v1545_v23 = vpop.permute.xlu0 %1544 }
0x216a   :  { %1986 = vmatmul.mubr.msk.bf16.vlgmr.msra.gmra.mrb[36].mxu0 %vm266_vm2, %v1545_v23  ;;  %v1809_v23 = vpack.c.bf16 %v717_v22, %v717_v22 }
0x223d   :  { %v1583_v26 = vpop.f32.mrb[36].mxu0 }
0x223e   :  { %v1589_v29 = vadd.f32 %v1583_v26, %v202_v24  ;;  %v1987_v13 = vpop.f32.mrb[37].mxu0  ;;  %v1811_v24 = vpack.c.bf16 %v901_v42, %v901_v42 }
0x223f   :  { %v1586_v31 = vpop.f32.mrb[38].mxu0  ;;  %v1817_v13 = vpack.c.bf16 %v1442_v56, %v1442_v56 }
0x2240   :  { %2129 = vtanh.f32 %v1589_v29  ;;  %v1988_v1 = vpop.f32.mrb[39].mxu0  ;;  %v1800_v35 = vmul.f32 -1.442695, %v1589_v29  ;;  %v1815_v29 = vpack.c.bf16 %v1270_v59, %v1270_v59 }
0x2242   :  { %2131 = vpow2.f32 %v1800_v35 }
0x224a   :  { %v2130_v19 = vpop.eup %2129 }
0x224b   :  { %1599 = vrot.lane.b32.xlu1 %v2130_v19, %s2299_s3 }
0x224c   :  { %v2132_v40 = vpop.eup %2131 }
0x224d   :  { %v1593_v30 = vadd.f32 1.0, %v2132_v40 }
0x224f   :  { %2133 = vrcp.f32 %v1593_v30 }
0x2259   :  { %v2134_v46 = vpop.eup %2133 }
0x225a   :  { %v1597_v55 = vmul.f32 %v2134_v46, %v2833_v18 }
0x22bd   :  { %v1600_v51 = vpop.permute.xlu1 %1599 }
0x22be   :  { %v1602_v54 = vmul.f32 %v2134_v46, %v1600_v51 }
0x22c0   :  { %1604 = vrot.lane.b32.xlu0 %v1602_v54, %s2306_s6  ;;  %v198_v54 = vadd.f32 %v2468_v16, %v2668_v61 }
0x2332   :  { %v1605_v58 = vpop.permute.xlu0 %1604 }
0x2333   :  { %v2836_v62 = vadd.f32 %v1605_v58, %v1597_v55 }
0x2335   :  { %2135 = vtanh.f32 %v2836_v62  ;;  %v1625_v16 = vsel %vm440_vm6, %v2836_v62, %v2833_v18  ;;  %v809_v18 = vsel %vm808_vm14, %v2635_v41, 0.0  ;;  %v1816_v41 = vpack.c.bf16 %v1356_v38, %v1356_v38 }
0x2336   :  { %2137 = vtanh.f32 %v2732_v12  ;;  %v912_v12 = vsel %vm900_vm3, %v2689_v48, %v2686_v37  ;;  %v533_v37 = vsel %vm532_vm8, %v2540_v45, 0.0  ;;  %v1094_v45 = vsel %vm992_vm5, %v2709_v4, 0.0 }
0x2337   :  { %2139 = vpow2.f32 %v1777_v25  ;;  %v1807_v48 = vpack.c.bf16 %v533_v37, %v533_v37  ;;  %v1813_v26 = vpack.c.bf16 %v1094_v45, %v1094_v45  ;;  %v1810_v5 = vpack.c.bf16 %v809_v18, %v809_v18 }
0x233f   :  { %v2136_v63 = vpop.eup %2135 }
0x2340   :  { %1610 = vrot.lane.b32.xlu1 %v2136_v63, %s2299_s3  ;;  %v2138_v50 = vpop.eup %2137 }
0x2341   :  { %v2140_v53 = vpop.eup %2139 }
0x2342   :  { %v966_v2 = vadd.f32 1.0, %v2140_v53 }
0x2344   :  { %972 = vrot.lane.b32.xlu1 %v2138_v50, %s2299_s3  ;;  %2141 = vrcp.f32 %v966_v2 }
0x234e   :  { %v2845_v9 = vpop.eup %2141 }
0x234f   :  { %v970_v11 = vmul.f32 %v2845_v9, %v912_v12 }
0x23b2   :  { %v1611_v7 = vpop.permute.xlu1 %1610 }
0x23b3   :  { %v1613_v47 = vmul.f32 %v2134_v46, %v1611_v7 }
0x23b5   :  { %v1624_v28 = vsel %vm440_vm6, %v1613_v47, %v1538_v6  ;;  %v1805_v6 = vpack.c.bf16 %v345_v20, %v345_v20  ;;  %v1614_v4 = vsel %vm440_vm6, %v1613_v47, 0.0 }
0x23b6   :  { %v973_v0 = vpop.permute.xlu1 %972  ;;  %v1627_v10 = vpack.c.bf16 %v1624_v28, %v1624_v28  ;;  %v1819_v31 = vpack.c.bf16 %v1614_v4, %v1614_v4 }
0x23b7   :  { %v975_v49 = vmul.f32 %v2845_v9, %v973_v0 }
0x23b8   :  { %1629 = vrot.lane.b32.xlu0 %v1627_v10, %s2306_s6 }
0x23b9   :  { %977 = vrot.lane.b32.xlu1 %v975_v49, %s2306_s6 }
0x242a   :  { %v1630_v15 = vpop.permute.xlu0 %1629 }
0x242b   :  { %1994 = vmatmul.mubr.msk.bf16.vlgmr.msra.gmra.mrb[36].mxu1 %vm266_vm2, %v1630_v15  ;;  %v978_v32 = vpop.permute.xlu1 %977 }
0x242c   :  { %v980_v3 = vadd.f32 %v978_v32, %v970_v11  ;;  %v441_v11 = vsel %vm440_vm6, %v2512_v8, 0.0 }
0x242d   :  { %v1806_v32 = vpack.c.bf16 %v441_v11, %v441_v11 }
0x242e   :  { %2143 = vtanh.f32 %v980_v3  ;;  %v625_v3 = vsel %vm624_vm10, %v2569_v21, 0.0  ;;  %v1814_v21 = vpack.c.bf16 %v1184_v17, %v1184_v17 }
0x2438   :  { %v2144_v14 = vpop.eup %2143 }
0x2439   :  { %983 = vrot.lane.b32.xlu1 %v2144_v14, %s2299_s3  ;;  %v1808_v14 = vpack.c.bf16 %v625_v3, %v625_v3 }
0x243d   :  { %350 = vrot.lane.b32.xlu1 %v1805_v6, %s2306_s6 }
0x2441   :  { %538 = vrot.lane.b32.xlu1 %v1807_v48, %s2306_s6 }
0x2445   :  { %722 = vrot.lane.b32.xlu1 %v1809_v23, %s2306_s6 }
0x2449   :  { %906 = vrot.lane.b32.xlu1 %v1811_v24, %s2306_s6 }
0x244d   :  { %1099 = vrot.lane.b32.xlu1 %v1813_v26, %s2306_s6 }
0x2451   :  { %1275 = vrot.lane.b32.xlu1 %v1815_v29, %s2306_s6 }
0x2455   :  { %1447 = vrot.lane.b32.xlu1 %v1817_v13, %s2306_s6 }
0x2459   :  { %1619 = vrot.lane.b32.xlu1 %v1819_v31, %s2306_s6 }
0x24ab   :  { %v984_v1 = vpop.permute.xlu1 %983 }
0x24ac   :  { %v986_v62 = vmul.f32 %v2845_v9, %v984_v1  ;;  %v1818_v9 = vpack.c.bf16 %v1528_v60, %v1528_v60 }
0x24ae   :  { %v993_v8 = vsel %vm992_vm5, %v986_v62, 0.0 }
0x24af   :  { %v351_v34 = vpop.permute.xlu1 %350  ;;  %v1812_v20 = vpack.c.bf16 %v993_v8, %v993_v8 }
0x24b0   :  { %354 = vst.msk [vmem:[#allocation12] sm:$0xf] %vm353_vm0, %v351_v34 }
0x24b3   :  { %v539_v19 = vpop.permute.xlu1 %538 }
0x24b4   :  { %542 = vst.msk [vmem:[#allocation12 + $0x8] sm:$0xf] %vm353_vm0, %v539_v19 }
0x24b7   :  { %v723_v52 = vpop.permute.xlu1 %722 }
0x24b8   :  { %726 = vst.msk [vmem:[#allocation12 + $0x10] sm:$0xf] %vm353_vm0, %v723_v52 }
0x24bb   :  { %v907_v35 = vpop.permute.xlu1 %906 }
0x24bc   :  { %910 = vst.msk [vmem:[#allocation12 + $0x18] sm:$0xf] %vm353_vm0, %v907_v35 }
0x24bf   :  { %v1100_v40 = vpop.permute.xlu1 %1099 }
0x24c0   :  { %1103 = vst.msk [vmem:[#allocation13 + $0x1c] sm:$0xf] %vm353_vm0, %v1100_v40 }
0x24c3   :  { %v1276_v30 = vpop.permute.xlu1 %1275 }
0x24c4   :  { %1279 = vst.msk [vmem:[#allocation13 + $0x14] sm:$0xf] %vm353_vm0, %v1276_v30 }
0x24c7   :  { %v1448_v46 = vpop.permute.xlu1 %1447 }
0x24c8   :  { %1451 = vst.msk [vmem:[#allocation13 + $0xc] sm:$0xf] %vm353_vm0, %v1448_v46 }
0x24cb   :  { %v1620_v51 = vpop.permute.xlu1 %1619 }
0x24cc   :  { %1623 = vst.msk [vmem:[#allocation13 + $0x4] sm:$0xf] %vm353_vm0, %v1620_v51 }
0x24fe   :  { %v1668_v55 = vpop.f32.mrb[36].mxu1 }
0x24ff   :  { %v1674_v58 = vadd.f32 %v1668_v55, %v198_v54  ;;  %v1995_v63 = vpop.f32.mrb[37].mxu1 }
0x2500   :  { %v1671_v50 = vpop.f32.mrb[38].mxu1 }
0x2501   :  { %2145 = vtanh.f32 %v1674_v58  ;;  %v1996_v25 = vpop.f32.mrb[39].mxu1  ;;  %v1803_v2 = vmul.f32 -1.442695, %v1674_v58 }
0x2503   :  { %2147 = vpow2.f32 %v1803_v2 }
0x250b   :  { %v2146_v53 = vpop.eup %2145 }
0x250c   :  { %1684 = vrot.lane.b32.xlu0 %v2146_v53, %s2299_s3 }
0x250d   :  { %v2148_v7 = vpop.eup %2147 }
0x250e   :  { %v1678_v47 = vadd.f32 1.0, %v2148_v7 }
0x2510   :  { %2149 = vrcp.f32 %v1678_v47 }
0x251a   :  { %v2150_v28 = vpop.eup %2149 }
0x251b   :  { %v1682_v61 = vmul.f32 %v2150_v28, %v1625_v16 }
0x257e   :  { %v1685_v0 = vpop.permute.xlu0 %1684 }
0x257f   :  { %v1687_v10 = vmul.f32 %v2150_v28, %v1685_v0 }
0x2581   :  { %1689 = vrot.lane.b32.xlu0 %v1687_v10, %s2306_s6 }
0x25f3   :  { %v1690_v49 = vpop.permute.xlu0 %1689 }
0x25f4   :  { %v1692_v12 = vadd.f32 %v1690_v49, %v1682_v61 }
0x25f6   :  { %2151 = vtanh.f32 %v1692_v12 }
0x2600   :  { %v2152_v15 = vpop.eup %2151 }
0x2601   :  { %1695 = vrot.lane.b32.xlu0 %v2152_v15, %s2299_s3 }
0x2605   :  { %446 = vrot.lane.b32.xlu0 %v1806_v32, %s2306_s6 }
0x2609   :  { %630 = vrot.lane.b32.xlu0 %v1808_v14, %s2306_s6 }
0x260d   :  { %814 = vrot.lane.b32.xlu0 %v1810_v5, %s2306_s6 }
0x2611   :  { %998 = vrot.lane.b32.xlu0 %v1812_v20, %s2306_s6 }
0x2615   :  { %1189 = vrot.lane.b32.xlu0 %v1814_v21, %s2306_s6 }
0x2619   :  { %1361 = vrot.lane.b32.xlu0 %v1816_v41, %s2306_s6 }
0x261d   :  { %1533 = vrot.lane.b32.xlu0 %v1818_v9, %s2306_s6 }
0x2673   :  { %v1696_v33 = vpop.permute.xlu0 %1695 }
0x2674   :  { %v1698_v36 = vmul.f32 %v2150_v28, %v1696_v33 }
0x2676   :  { %v1699_v6 = vsel %vm344_vm4, %v1698_v36, 0.0 }
0x2677   :  { %v1820_v37 = vpack.c.bf16 %v1699_v6, %v1699_v6  ;;  %v447_v57 = vpop.permute.xlu0 %446 }
0x2678   :  { %450 = vst.msk [vmem:[#allocation12 + $0x4] sm:$0xf] %vm353_vm0, %v447_v57 }
0x2679   :  { %1704 = vrot.lane.b32.xlu0 %v1820_v37, %s2306_s6 }
0x267b   :  { %v631_v44 = vpop.permute.xlu0 %630 }
0x267c   :  { %634 = vst.msk [vmem:[#allocation12 + $0xc] sm:$0xf] %vm353_vm0, %v631_v44 }
0x267f   :  { %v815_v43 = vpop.permute.xlu0 %814 }
0x2680   :  { %818 = vst.msk [vmem:[#allocation12 + $0x14] sm:$0xf] %vm353_vm0, %v815_v43 }
0x2683   :  { %v999_v27 = vpop.permute.xlu0 %998 }
0x2684   :  { %1002 = vst.msk [vmem:[#allocation12 + $0x1c] sm:$0xf] %vm353_vm0, %v999_v27 }
0x2685   :  { %2252 = shalt.err (!%p2249_p8)
}
0x2686   :  { %s2253_s20 = scalar_lea.hbm %s2981_s7, 512 }
0x2687   :  { %p2254_p9 = scmp.ne.s32.totalorder %s2981_s7, %s2253_s20  ;;  %p2257_p10 = scmp.lt.u32.totalorder %s2253_s20, %s2981_s7 }
0x2689   :  { %p2259_p11 = pnand %p2257_p10, %p2254_p9 }
0x268b   :  { %2262 = shalt.err (!%p2259_p11)
}
0x268c   :  { %1719 = dma.vmem_to_hbm [thread:$0]  %s1714_s21, 512, %s2981_s7, [#allocation6], %s2299_s3, %s2299_s3, %s2300_s28   ;;  %v1190_v39 = vpop.permute.xlu0 %1189 }
0x268d   :  { %1193 = vst.msk [vmem:[#allocation13 + $0x18] sm:$0xf] %vm353_vm0, %v1190_v39  ;;  %s2309_s9 = smov [#allocation13]  }
0x268e   :  { %s1725_s10 = sshll.u32 %s2309_s9, 4  ;;  %s1726_s10 = int_to_ptr.vmem [resolvable:$true] %s1725_s10 }
0x268f   :  { %s2263_s12 = scalar_lea.vmem %s1726_s10, 512  ;;  %p2268_p13 = scmp.lt.s32.totalorder %s1726_s10, %s1726_s10 }
0x2690   :  { %v1362_v48 = vpop.permute.xlu0 %1361  ;;  %p2264_p12 = scmp.ne.s32.totalorder %s1726_s10, %s2263_s12  ;;  %p2269_p0 = scmp.lt.s32.totalorder %s2263_s12, %s2263_s12 }
0x2691   :  { %1365 = vst.msk [vmem:[#allocation13 + $0x10] sm:$0xf] %vm353_vm0, %v1362_v48 }
0x2692   :  { %p2270_p1 = por %p2269_p0, %p2268_p13 }
0x2694   :  { %v1534_v22 = vpop.permute.xlu0 %1533  ;;  %p2271_p2 = pnand %p2270_p1, %p2264_p12 }
0x2695   :  { %1537 = vst.msk [vmem:[#allocation13 + $0x8] sm:$0xf] %vm353_vm0, %v1534_v22 }
0x26eb   :  { %v1705_v23 = vpop.permute.xlu0 %1704 }
0x26ec   :  { %1707 = vst.msk [vmem:[#allocation13] sm:$0xf] %vm353_vm0, %v1705_v23 }
0x26ed   :  { %2274 = shalt.err (!%p2271_p2)
}
0x26ee   :  { %s2275_s15 = scalar_lea.hbm %s2982_s8, 512 }
0x26ef   :  { %p2276_p3 = scmp.ne.s32.totalorder %s2982_s8, %s2275_s15  ;;  %p2279_p4 = scmp.lt.u32.totalorder %s2275_s15, %s2982_s8 }
0x26f1   :  { %p2281_p5 = pnand %p2279_p4, %p2276_p3 }
0x26f3   :  { %2284 = shalt.err (!%p2281_p5)
}
0x26f4   :  { %1731 = dma.vmem_to_hbm [thread:$0]  %s1726_s10, 512, %s2982_s8, [#allocation14], %s2299_s3, %s2299_s3, %s2300_s28  }
0x26f5   :  { %2291 = dma.done.wait [#allocation6], 512  }
0x26f6   :  { %2292 = vsyncadd [#allocation6], 4294966784 }
0x26f7   :  { %2293 = dma.done.wait [#allocation14], 512  }
0x26f8   :  { %2294 = vsyncadd [#allocation14], 4294966784 }
0x26f9   :  { %1738 = vsyncpa [#allocation5], 1 }
0x26fa   :  { %1739 = vsyncpa [#allocation8], 1 }
0x26fb   :  { %1740 = vsyncpa [#allocation11], 1 }
0x26fc   :  { %1741 = vsyncpa [#allocation6], 1 }
0x26fd   :  { %1742 = vsyncpa [#allocation14], 1 }

</bundles_post_ra>
